<compile_context>
chip_gen: v7x
topology: tpu7x:2x2x1
jax: 0.10.0
libtpu: 0.0.40
codegen_flags: <defaults>
</compile_context>

<pallas_src>
import jax
import jax.numpy as jnp
from jax.experimental import pallas as pl
from jax.experimental.pallas import tpu as pltpu


# ----------------------------------------------------------------------------
# Kernel 1: attention + attn_combine + stacked LSTM  (single grid step)
# ----------------------------------------------------------------------------
def attn_lstm_kernel(
    emb_ref, h_ref, c_ref, enc_ref, encp_ref, mask_ref,
    wad_ref, bad_ref, wv_ref, bv_ref,
    wce_ref, wcc_ref, bcomb_ref, wlstm_ref, blstm_ref,
    xt_ref, hout_ref, cout_ref, attn_ref,
):
    L, B, H = h_ref.shape
    bf16 = jnp.bfloat16
    f32 = jnp.float32

    # additive attention: tanh((Wa*enc + b_a) + Ua*dec + b_u) . v
    # (Wa*enc + b_a) is decode-step invariant -> precomputed per sequence (encp_ref).
    dec_h = h_ref[L - 1].astype(bf16)                               # hidden[0][-1]
    e_dec = jnp.dot(dec_h, wad_ref[...],
                    preferred_element_type=f32) + bad_ref[...]      # (B,H) f32
    # energy kept f32 (v5e VPU/EUP have no native bf16); it is a small op now
    # that the encoder projection is hoisted.
    energy = jnp.tanh(encp_ref[...].astype(f32) + e_dec[:, None, :])   # (B,S,H)
    # v-projection: VPU mul + lane reduce (cheap for moderate H).
    # TODO(synk): for H >= 256 switch this to an MXU (B*S,H)@(H,128) form.
    scores = jnp.sum(energy * wv_ref[...], axis=-1) + bv_ref[0]        # (B,S)
    scores = jnp.where(mask_ref[...] > 0.5, scores, -1e9)

    smax = jnp.max(scores, axis=1, keepdims=True)
    p = jnp.exp(scores - smax)
    attn = p * pl.reciprocal(jnp.sum(p, axis=1, keepdims=True), approx=True)
    attn_ref[...] = attn

    # context = bmm(attn (B,1,S), enc (B,S,H)) -> (B,H).
    # Kept as the batched dot_general (known-good lowering); for very small S an
    # elementwise multiply + sublane reduce would avoid per-batch MXU pushes.
    context = jax.lax.dot_general(
        attn.astype(bf16)[:, None, :], enc_ref[...],
        dimension_numbers=(((2,), (1,)), ((0,), (0,))),
        preferred_element_type=f32)[:, 0, :]

    # attn_combine (+relu); concat removed: the two dots accumulate on the MXU.
    x_t = (jnp.dot(emb_ref[...], wce_ref[...], preferred_element_type=f32)
           + jnp.dot(context.astype(bf16), wcc_ref[...], preferred_element_type=f32)
           + bcomb_ref[...])
    x_t = jnp.maximum(x_t, 0.0)                                        # (B,H) f32

    # stacked LSTM, single time step (PyTorch gate order i, f, g, o).
    # Input & recurrent matmuls fused: [x_t, h_prev] @ W(2H,4H)  (one dot per layer).
    for layer in range(L):
        h_prev = h_ref[layer]                                          # f32 state
        c_prev = c_ref[layer]
        xh = jnp.concatenate([x_t, h_prev], axis=1).astype(bf16)       # (B,2H)
        gates = (jnp.dot(xh, wlstm_ref[layer], preferred_element_type=f32)
                 + blstm_ref[layer])                                   # (B,4H) f32
        i_g = jax.nn.sigmoid(gates[:, 0 * H:1 * H])
        f_g = jax.nn.sigmoid(gates[:, 1 * H:2 * H])
        g_g = jnp.tanh(gates[:, 2 * H:3 * H])
        o_g = jax.nn.sigmoid(gates[:, 3 * H:4 * H])
        c_new = f_g * c_prev + i_g * g_g
        h_new = o_g * jnp.tanh(c_new)
        hout_ref[layer] = h_new
        cout_ref[layer] = c_new
        x_t = h_new

    xt_ref[...] = x_t.astype(bf16)       # bf16 handoff to the projection kernel


# ----------------------------------------------------------------------------
# Kernel 2: vocab projection, streamed over V with online log-sum-exp.
# Grid = (chunk, tile); chunk axis is "parallel" (both TCs on v7x), tile axis
# streams double/triple-buffered w_out tiles.
# ----------------------------------------------------------------------------
def vocab_proj_kernel(xt_ref, wout_ref, bout_ref, logits_ref, lse_ref,
                      mstat_ref, lstat_ref):
    j = pl.program_id(1)
    nj = pl.num_programs(1)

    @pl.when(j == 0)
    def _init():
        mstat_ref[...] = jnp.full_like(mstat_ref, -1e30)
        lstat_ref[...] = jnp.zeros_like(lstat_ref)

    # x_t is already bf16 -> no per-tile cast in the hot loop.
    logits = (jnp.dot(xt_ref[...], wout_ref[...],
                      preferred_element_type=jnp.float32) + bout_ref[...])
    logits_ref[...] = logits

    # online log-sum-exp statistics across this chunk's V tiles
    m_prev = mstat_ref[...]
    m_new = jnp.maximum(m_prev, jnp.max(logits, axis=1, keepdims=True))
    lstat_ref[...] = (lstat_ref[...] * jnp.exp(m_prev - m_new)
                      + jnp.sum(jnp.exp(logits - m_new), axis=1, keepdims=True))
    mstat_ref[...] = m_new

    @pl.when(j == nj - 1)
    def _finalize():
        lse_ref[0] = mstat_ref[...] + jnp.log(lstat_ref[...])


# ----------------------------------------------------------------------------
# Small helpers
# ----------------------------------------------------------------------------
def _vmem_limit_bytes():
    """Budget VMEM from the actual chip (64 MiB v7x, 128 MiB v5e/v6e) w/ headroom."""
    try:
        cap = int(pltpu.get_tpu_info().vmem_capacity_bytes)
    except Exception:
        cap = 64 * 1024 * 1024
    return min(cap - cap // 8, 112 * 1024 * 1024)


def _maybe_buffered_spec(block_shape, index_map, depth):
    """BlockSpec with pipeline_mode=pl.Buffered(depth); falls back if unsupported."""
    if depth != 2 and hasattr(pl, "Buffered"):
        try:
            return pl.BlockSpec(block_shape, index_map,
                                pipeline_mode=pl.Buffered(depth))
        except TypeError:   # older jax: no pipeline_mode kwarg
            pass
    return pl.BlockSpec(block_shape, index_map)


# ----------------------------------------------------------------------------
# One-time parameter preparation (hoisted out of the per-token decode step)
# ----------------------------------------------------------------------------
def prepare_params(params, tile_v=512):
    """Transpose / split / bf16-cast PyTorch-layout f32 params ONCE per model."""
    f32, bf16 = jnp.float32, jnp.bfloat16
    H = params["w_ae"].shape[0]
    L = params["w_ih"].shape[0]
    V = params["w_out"].shape[0]
    v_pad = ((V + tile_v - 1) // tile_v) * tile_v
    nv = v_pad // tile_v
    nchunk = 2 if nv % 2 == 0 else 1          # vocab split for the parallel axis

    w_out = params["w_out"].T.astype(bf16)                        # (H, V)
    b_out = params["b_out"].astype(f32)
    if v_pad != V:
        # padded logits get bias -1e30 so they never affect the log-sum-exp
        w_out = jnp.pad(w_out, ((0, 0), (0, v_pad - V)))
        b_out = jnp.pad(b_out, (0, v_pad - V), constant_values=-1e30)
    # TODO(synk): on v7x, w_out could be stored fp8 + per-column scale to halve
    # the dominant HBM stream; kept bf16 here for accuracy & portability.

    # fused LSTM weights: (L, 2H, 4H), rows [0:H] input path, [H:2H] recurrent path
    w_lstm = jnp.concatenate(
        [jnp.transpose(params["w_ih"], (0, 2, 1)),
         jnp.transpose(params["w_hh"], (0, 2, 1))], axis=1).astype(bf16)

    return dict(
        emb=params["emb"].astype(bf16),
        w_ae=params["w_ae"].T.astype(bf16),           # used only in prepare_encoder
        b_ae=params["b_ae"].astype(f32),
        w_ad=params["w_ad"].T.astype(bf16),
        b_ad=params["b_ad"].reshape(1, H).astype(f32),
        w_v=params["w_v"].reshape(1, H).astype(f32),
        b_v=params["b_v"].reshape(1).astype(f32),
        w_comb_e=params["w_comb"][:, :H].T.astype(bf16),   # embedded half
        w_comb_c=params["w_comb"][:, H:].T.astype(bf16),   # context half
        b_comb=params["b_comb"].reshape(1, H).astype(f32),
        w_lstm=w_lstm,
        b_lstm=(params["b_ih"] + params["b_hh"]).reshape(L, 1, 4 * H).astype(f32),
        w_out=w_out, b_out=b_out.reshape(1, v_pad),
        meta=dict(H=H, L=L, V=V, v_pad=v_pad, tile_v=tile_v, nv=nv, nchunk=nchunk),
    )


# ----------------------------------------------------------------------------
# Once-per-source-sequence preparation (hoisted out of the per-token path)
# ----------------------------------------------------------------------------
def prepare_encoder(kparams, encoder_outputs, encoder_mask=None):
    """encoder_outputs: (S,B,H) f32. Computes layout transpose, mask, and the
    decode-step-invariant projection enc_proj = enc @ W_ae + b_ae."""
    bf16 = jnp.bfloat16
    S, B, H = encoder_outputs.shape
    enc_bsh = jnp.transpose(encoder_outputs, (1, 0, 2)).astype(bf16)       # (B,S,H)
    enc_proj = (jnp.einsum("bsh,hk->bsk", enc_bsh, kparams["w_ae"],
                           preferred_element_type=jnp.float32)
                + kparams["b_ae"]).astype(bf16)                            # (B,S,H)
    mask = (jnp.ones((B, S), jnp.float32) if encoder_mask is None
            else encoder_mask.astype(jnp.float32))
    return dict(enc=enc_bsh, enc_proj=enc_proj, mask=mask)


# ----------------------------------------------------------------------------
# Forward wrapper (one decode step)
# ----------------------------------------------------------------------------
def attn_decoder_forward(kparams, enc_prep, x, hidden):
    """x: (1,B) int32; hidden: (h0,c0) each (L,B,H); enc_prep from prepare_encoder."""
    h0, c0 = hidden
    L, B, H = h0.shape
    S = enc_prep["enc"].shape[1]
    meta = kparams["meta"]
    V, v_pad, tv = meta["V"], meta["v_pad"], meta["tile_v"]
    nv, nchunk = meta["nv"], meta["nchunk"]
    nvj = nv // nchunk
    vmem_limit = _vmem_limit_bytes()

    # glue: embedding gather only.
    # TODO(synk): nn.Dropout(p=0.1) omitted (eval/inference semantics -> identity).
    embedded = kparams["emb"][x[0]]                                  # (B,H) bf16
    h0 = h0.astype(jnp.float32)
    c0 = c0.astype(jnp.float32)

    def const_spec(shape):
        # whole-array VMEM block, constant across the grid
        return pl.BlockSpec(shape, lambda *_: (0,) * len(shape))

    # --- stage 1: attention + combine + LSTM (single step).  Its weights are
    #     released before the vocab-projection stream below, so they never sit
    #     idle in VMEM during the w_out stream. --------------------------------
    xt, h_new, c_new, attn = pl.pallas_call(
        attn_lstm_kernel,
        grid_spec=pltpu.PrefetchScalarGridSpec(
            num_scalar_prefetch=0,
            grid=(1,),
            in_specs=[
                const_spec((B, H)),             # embedded (bf16)
                const_spec((L, B, H)),          # h0
                const_spec((L, B, H)),          # c0
                const_spec((B, S, H)),          # encoder outputs (bf16)
                const_spec((B, S, H)),          # enc_proj (bf16, hoisted per sequence)
                const_spec((B, S)),             # mask
                const_spec((H, H)),             # w_ad
                const_spec((1, H)),             # b_ad
                const_spec((1, H)),             # w_v
                pl.BlockSpec(memory_space=pltpu.MemorySpace.SMEM),   # b_v scalar
                const_spec((H, H)),             # w_comb (embedded half)
                const_spec((H, H)),             # w_comb (context half)
                const_spec((1, H)),             # b_comb
                const_spec((L, 2 * H, 4 * H)),  # fused [w_ih ; w_hh]
                const_spec((L, 1, 4 * H)),      # b_ih + b_hh
            ],
            out_specs=(
                const_spec((B, H)),             # x_t (bf16)
                const_spec((L, B, H)),          # new h
                const_spec((L, B, H)),          # new c
                const_spec((B, S)),             # attention weights
            ),
        ),
        out_shape=(
            jax.ShapeDtypeStruct((B, H), jnp.bfloat16),
            jax.ShapeDtypeStruct((L, B, H), jnp.float32),
            jax.ShapeDtypeStruct((L, B, H), jnp.float32),
            jax.ShapeDtypeStruct((B, S), jnp.float32),
        ),
        compiler_params=pltpu.CompilerParams(
            dimension_semantics=("arbitrary",),
            vmem_limit_bytes=vmem_limit),
    )(embedded, h0, c0, enc_prep["enc"], enc_prep["enc_proj"], enc_prep["mask"],
      kparams["w_ad"], kparams["b_ad"], kparams["w_v"], kparams["b_v"],
      kparams["w_comb_e"], kparams["w_comb_c"], kparams["b_comb"],
      kparams["w_lstm"], kparams["b_lstm"])

    # --- stage 2: vocab projection, w_out streamed with an online LSE.
    #     Leading "parallel" chunk axis -> both v7x TensorCores share the stream. --
    wout_depth = 3 if nvj >= 3 else 2
    logits, lse_c = pl.pallas_call(
        vocab_proj_kernel,
        grid_spec=pltpu.PrefetchScalarGridSpec(
            num_scalar_prefetch=0,
            grid=(nchunk, nvj),
            in_specs=[
                const_spec((B, H)),                                        # x_t (bf16)
                _maybe_buffered_spec((H, tv), lambda c, j: (0, c * nvj + j),
                                     wout_depth),                          # w_out tile
                _maybe_buffered_spec((1, tv), lambda c, j: (0, c * nvj + j),
                                     wout_depth),                          # b_out tile
            ],
            out_specs=(
                pl.BlockSpec((B, tv), lambda c, j: (0, c * nvj + j)),      # logits tile
                pl.BlockSpec((1, B, 1), lambda c, j: (c, 0, 0)),           # chunk LSE
            ),
            scratch_shapes=[
                pltpu.VMEM((B, 1), jnp.float32),   # running max
                pltpu.VMEM((B, 1), jnp.float32),   # running sum-exp
            ],
        ),
        out_shape=(
            jax.ShapeDtypeStruct((B, v_pad), jnp.float32),
            jax.ShapeDtypeStruct((nchunk, B, 1), jnp.float32),
        ),
        compiler_params=pltpu.CompilerParams(
            dimension_semantics=("parallel", "arbitrary"),
            vmem_limit_bytes=vmem_limit),
    )(xt, kparams["w_out"], kparams["b_out"])

    # combine per-chunk LSE partials + final log-softmax normalization; drop padding
    lse = jax.nn.logsumexp(lse_c, axis=0)                 # (B, 1)
    logp = (logits - lse)[:, :V]
    return logp, (h_new, c_new), attn


# ----------------------------------------------------------------------------
# Parameter init (PyTorch (out_features, in_features) layout) + pure-JAX reference
# ----------------------------------------------------------------------------
def init_params(key, hidden, vocab, num_layers):
    H, V, L = hidden, vocab, num_layers
    ks = jax.random.split(key, 15)

    def n(k, shape, scale=0.1):
        return scale * jax.random.normal(k, shape, dtype=jnp.float32)

    return dict(
        emb=n(ks[0], (V, H)),
        w_ae=n(ks[1], (H, H)), b_ae=n(ks[2], (H,)),
        w_ad=n(ks[3], (H, H)), b_ad=n(ks[4], (H,)),
        w_v=n(ks[5], (1, H)), b_v=n(ks[6], (1,)),
        w_comb=n(ks[7], (H, 2 * H)), b_comb=n(ks[8], (H,)),
        w_ih=n(ks[9], (L, 4 * H, H)), w_hh=n(ks[10], (L, 4 * H, H)),
        b_ih=n(ks[11], (L, 4 * H)), b_hh=n(ks[12], (L, 4 * H)),
        w_out=n(ks[13], (V, H)), b_out=n(ks[14], (V,)),
    )


def reference_forward(params, x, hidden, encoder_outputs, encoder_mask=None):
    """Pure-JAX f32 reference mirroring the PyTorch module (eval mode)."""
    h0, c0 = hidden
    L = h0.shape[0]
    emb = params["emb"][x[0]]
    enc = jnp.transpose(encoder_outputs, (1, 0, 2))               # (B,S,H)
    dec_h = h0[-1]
    energy = jnp.tanh(enc @ params["w_ae"].T + params["b_ae"]
                      + (dec_h @ params["w_ad"].T + params["b_ad"])[:, None, :])
    scores = jnp.squeeze(energy @ params["w_v"].T, -1) + params["b_v"]
    if encoder_mask is not None:
        scores = jnp.where(encoder_mask, scores, -1e9)
    attn = jax.nn.softmax(scores, axis=1)
    context = jnp.einsum("bs,bsh->bh", attn, enc)
    x_t = jax.nn.relu(jnp.concatenate([emb, context], axis=1) @ params["w_comb"].T
                      + params["b_comb"])
    hs, cs = [], []
    for layer in range(L):
        gates = (x_t @ params["w_ih"][layer].T + params["b_ih"][layer]
                 + h0[layer] @ params["w_hh"][layer].T + params["b_hh"][layer])
        i_g, f_g, g_g, o_g = jnp.split(gates, 4, axis=1)
        i_g, f_g, o_g = jax.nn.sigmoid(i_g), jax.nn.sigmoid(f_g), jax.nn.sigmoid(o_g)
        g_g = jnp.tanh(g_g)
        c_new = f_g * c0[layer] + i_g * g_g
        h_new = o_g * jnp.tanh(c_new)
        hs.append(h_new)
        cs.append(c_new)
        x_t = h_new
    logits = x_t @ params["w_out"].T + params["b_out"]
    logp = jax.nn.log_softmax(logits, axis=1)
    return logp, (jnp.stack(hs), jnp.stack(cs)), attn


# ----------------------------------------------------------------------------
# Demo / self-test
# ----------------------------------------------------------------------------
if __name__ == "__main__":
    # Small, lane/sublane-aligned shapes; V=4000 exercises padding, multi-tile
    # streaming, the parallel chunk axis, and the deeper w_out buffering.
    H, V, L, B, S = 128, 4000, 2, 8, 16
    key = jax.random.PRNGKey(0)
    kp_, kx, kh, kc, ke = jax.random.split(key, 5)

    params = init_params(kp_, H, V, L)
    x = jax.random.randint(kx, (1, B), 0, V, dtype=jnp.int32)       # one decoder step
    h0 = 0.1 * jax.random.normal(kh, (L, B, H), dtype=jnp.float32)
    c0 = 0.1 * jax.random.normal(kc, (L, B, H), dtype=jnp.float32)
    enc = 0.1 * jax.random.normal(ke, (S, B, H), dtype=jnp.float32)
    lens = S - (jnp.arange(B) % 5)                                  # varied valid lengths
    enc_mask = (jnp.arange(S)[None, :] < lens[:, None])             # (B,S) bool

    kparams = prepare_params(params, tile_v=512)       # once per model
    enc_prep = prepare_encoder(kparams, enc, enc_mask) # once per source sequence

    logp, (h1, c1), attn = attn_decoder_forward(kparams, enc_prep, x, (h0, c0))
    jax.block_until_ready((logp, h1, c1, attn))

    # correctness vs pure-JAX f32 reference (bf16-weight tolerance)
    logp_r, (h_r, c_r), attn_r = reference_forward(params, x, (h0, c0), enc, enc_mask)

    assert logp.shape == (B, V) and attn.shape == (B, S)
    assert h1.shape == (L, B, H) and c1.shape == (L, B, H)
    assert bool(jnp.all(jnp.isfinite(logp)))
    assert bool(jnp.allclose(jnp.sum(attn, axis=1), 1.0, atol=1e-2))
    assert bool(jnp.allclose(jnp.sum(jnp.exp(logp), axis=1), 1.0, atol=1e-3))
    assert bool(jnp.allclose(attn, attn_r, atol=2e-2))
    assert bool(jnp.allclose(h1, h_r, atol=5e-2))
    assert bool(jnp.allclose(c1, c_r, atol=5e-2))
    assert bool(jnp.allclose(logp, logp_r, atol=7e-2))
    print("KERNEL_OK")
</pallas_src>

<mosaic_0001>
module attributes {stable_mosaic.version = 11 : i64} {
  func.func @attn_lstm_kernel(%arg0: i32, %arg1: memref<8x128xbf16, #tpu.memory_space<vmem>>, %arg2: memref<2x8x128xf32, #tpu.memory_space<vmem>>, %arg3: memref<2x8x128xf32, #tpu.memory_space<vmem>>, %arg4: memref<8x16x128xbf16, #tpu.memory_space<vmem>>, %arg5: memref<8x16x128xbf16, #tpu.memory_space<vmem>>, %arg6: memref<8x16xf32, #tpu.memory_space<vmem>>, %arg7: memref<128x128xbf16, #tpu.memory_space<vmem>>, %arg8: memref<1x128xf32, #tpu.memory_space<vmem>>, %arg9: memref<1x128xf32, #tpu.memory_space<vmem>>, %arg10: memref<1xf32, #tpu.memory_space<smem>>, %arg11: memref<128x128xbf16, #tpu.memory_space<vmem>>, %arg12: memref<128x128xbf16, #tpu.memory_space<vmem>>, %arg13: memref<1x128xf32, #tpu.memory_space<vmem>>, %arg14: memref<2x256x512xbf16, #tpu.memory_space<vmem>>, %arg15: memref<2x1x512xf32, #tpu.memory_space<vmem>>, %arg16: memref<8x128xbf16, #tpu.memory_space<vmem>>, %arg17: memref<2x8x128xf32, #tpu.memory_space<vmem>>, %arg18: memref<2x8x128xf32, #tpu.memory_space<vmem>>, %arg19: memref<8x16xf32, #tpu.memory_space<vmem>>) attributes {dimension_semantics = [#tpu.dimension_semantics<arbitrary>], iteration_bounds = array<i64: 1>, scalar_prefetch = 0 : i64, scratch_operands = 0 : i64, tpu.core_type = #tpu.core_type<tc>, window_params = [{pipeline_mode = #tpu.pipeline_mode<synchronous>, transform_indices = @transform_0, window_bounds = array<i64: 8, 128>}, {pipeline_mode = #tpu.pipeline_mode<synchronous>, transform_indices = @transform_1, window_bounds = array<i64: 2, 8, 128>}, {pipeline_mode = #tpu.pipeline_mode<synchronous>, transform_indices = @transform_2, window_bounds = array<i64: 2, 8, 128>}, {pipeline_mode = #tpu.pipeline_mode<synchronous>, transform_indices = @transform_3, window_bounds = array<i64: 8, 16, 128>}, {pipeline_mode = #tpu.pipeline_mode<synchronous>, transform_indices = @transform_4, window_bounds = array<i64: 8, 16, 128>}, {pipeline_mode = #tpu.pipeline_mode<synchronous>, transform_indices = @transform_5, window_bounds = array<i64: 8, 16>}, {pipeline_mode = #tpu.pipeline_mode<synchronous>, transform_indices = @transform_6, window_bounds = array<i64: 128, 128>}, {pipeline_mode = #tpu.pipeline_mode<synchronous>, transform_indices = @transform_7, window_bounds = array<i64: 1, 128>}, {pipeline_mode = #tpu.pipeline_mode<synchronous>, transform_indices = @transform_8, window_bounds = array<i64: 1, 128>}, {transform_indices = @transform_9, window_bounds = array<i64: 1>}, {pipeline_mode = #tpu.pipeline_mode<synchronous>, transform_indices = @transform_10, window_bounds = array<i64: 128, 128>}, {pipeline_mode = #tpu.pipeline_mode<synchronous>, transform_indices = @transform_11, window_bounds = array<i64: 128, 128>}, {pipeline_mode = #tpu.pipeline_mode<synchronous>, transform_indices = @transform_12, window_bounds = array<i64: 1, 128>}, {pipeline_mode = #tpu.pipeline_mode<synchronous>, transform_indices = @transform_13, window_bounds = array<i64: 2, 256, 512>}, {pipeline_mode = #tpu.pipeline_mode<synchronous>, transform_indices = @transform_14, window_bounds = array<i64: 2, 1, 512>}, {pipeline_mode = #tpu.pipeline_mode<synchronous>, transform_indices = @transform_15, window_bounds = array<i64: 8, 128>}, {pipeline_mode = #tpu.pipeline_mode<synchronous>, transform_indices = @transform_16, window_bounds = array<i64: 2, 8, 128>}, {pipeline_mode = #tpu.pipeline_mode<synchronous>, transform_indices = @transform_17, window_bounds = array<i64: 2, 8, 128>}, {pipeline_mode = #tpu.pipeline_mode<synchronous>, transform_indices = @transform_18, window_bounds = array<i64: 8, 16>}]} {
    %c1 = arith.constant 1 : index
    %c0 = arith.constant 0 : index
    %c0_0 = arith.constant 0 : index
    %0 = vector.load %arg2[%c1, %c0, %c0_0] : memref<2x8x128xf32, #tpu.memory_space<vmem>>, vector<1x8x128xf32>
    %1 = vector.shape_cast %0 : vector<1x8x128xf32> to vector<8x128xf32>
    %2 = arith.truncf %1 : vector<8x128xf32> to vector<8x128xbf16>
    %c0_1 = arith.constant 0 : index
    %c0_2 = arith.constant 0 : index
    %3 = vector.load %arg7[%c0_1, %c0_2] : memref<128x128xbf16, #tpu.memory_space<vmem>>, vector<128x128xbf16>
    %cst = arith.constant dense<0.000000e+00> : vector<8x128xf32>
    %4 = tpu.matmul %2, %3, %cst {dimension_numbers = #tpu.dot_dimension_numbers<[1], [0], [0], [1], [0, 0, 1, 1], [], []>} : vector<8x128xbf16>, vector<128x128xbf16>, vector<8x128xf32> -> vector<8x128xf32>
    %c0_3 = arith.constant 0 : index
    %c0_4 = arith.constant 0 : index
    %5 = vector.load %arg8[%c0_3, %c0_4] : memref<1x128xf32, #tpu.memory_space<vmem>>, vector<1x128xf32>
    %6 = vector.broadcast %5 : vector<1x128xf32> to vector<8x128xf32>
    %7 = arith.addf %4, %6 : vector<8x128xf32>
    %c0_5 = arith.constant 0 : index
    %c0_6 = arith.constant 0 : index
    %c0_7 = arith.constant 0 : index
    %8 = vector.load %arg5[%c0_5, %c0_6, %c0_7] : memref<8x16x128xbf16, #tpu.memory_space<vmem>>, vector<8x16x128xbf16>
    %9 = arith.extf %8 : vector<8x16x128xbf16> to vector<8x16x128xf32>
    %10 = vector.shape_cast %7 : vector<8x128xf32> to vector<8x1x128xf32>
    %11 = vector.broadcast %10 : vector<8x1x128xf32> to vector<8x16x128xf32>
    %12 = arith.addf %9, %11 : vector<8x16x128xf32>
    %13 = math.tanh %12 : vector<8x16x128xf32>
    %c0_8 = arith.constant 0 : index
    %c0_9 = arith.constant 0 : index
    %14 = vector.load %arg9[%c0_8, %c0_9] : memref<1x128xf32, #tpu.memory_space<vmem>>, vector<1x128xf32>
    %15 = vector.shape_cast %14 : vector<1x128xf32> to vector<1x1x128xf32>
    %16 = vector.broadcast %15 : vector<1x1x128xf32> to vector<8x16x128xf32>
    %17 = arith.mulf %13, %16 : vector<8x16x128xf32>
    %cst_10 = arith.constant dense<0.000000e+00> : vector<8x16xf32>
    %18 = vector.multi_reduction <add>, %17, %cst_10 [2] : vector<8x16x128xf32> to vector<8x16xf32>
    %c0_11 = arith.constant 0 : index
    %19 = memref.load %arg10[%c0_11] : memref<1xf32, #tpu.memory_space<smem>>
    %20 = vector.broadcast %19 : f32 to vector<8x16xf32>
    %21 = arith.addf %18, %20 : vector<8x16xf32>
    %c0_12 = arith.constant 0 : index
    %c0_13 = arith.constant 0 : index
    %22 = vector.load %arg6[%c0_12, %c0_13] : memref<8x16xf32, #tpu.memory_space<vmem>>, vector<8x16xf32>
    %cst_14 = arith.constant 5.000000e-01 : f32
    %23 = vector.broadcast %cst_14 : f32 to vector<8x16xf32>
    %24 = arith.cmpf ogt, %22, %23 : vector<8x16xf32>
    %cst_15 = arith.constant -1.000000e+09 : f32
    %25 = vector.broadcast %cst_15 : f32 to vector<8x16xf32>
    %26 = arith.select %24, %21, %25 : vector<8x16xi1>, vector<8x16xf32>
    %cst_16 = arith.constant dense<0xFF800000> : vector<8xf32>
    %27 = vector.multi_reduction <maximumf>, %26, %cst_16 [1] : vector<8x16xf32> to vector<8xf32>
    %28 = vector.shape_cast %27 : vector<8xf32> to vector<8x1xf32>
    %29 = vector.broadcast %28 : vector<8x1xf32> to vector<8x16xf32>
    %30 = arith.subf %26, %29 : vector<8x16xf32>
    %31 = math.exp %30 : vector<8x16xf32>
    %cst_17 = arith.constant dense<0.000000e+00> : vector<8xf32>
    %32 = vector.multi_reduction <add>, %31, %cst_17 [1] : vector<8x16xf32> to vector<8xf32>
    %33 = vector.shape_cast %32 : vector<8xf32> to vector<8x1xf32>
    %34 = tpu.reciprocal %33 {approx = true} : vector<8x1xf32> -> vector<8x1xf32>
    %35 = vector.broadcast %34 : vector<8x1xf32> to vector<8x16xf32>
    %36 = arith.mulf %31, %35 : vector<8x16xf32>
    %c0_18 = arith.constant 0 : index
    %c0_19 = arith.constant 0 : index
    %37 = vector.load %arg19[%c0_18, %c0_19] : memref<8x16xf32, #tpu.memory_space<vmem>>, vector<8x16xf32>
    tpu.vector_store %arg19[%c0_18, %c0_19], %36 {strides = array<i32>} : memref<8x16xf32, #tpu.memory_space<vmem>>, vector<8x16xf32>,
    %38 = arith.truncf %36 : vector<8x16xf32> to vector<8x16xbf16>
    %39 = vector.shape_cast %38 : vector<8x16xbf16> to vector<8x1x16xbf16>
    %c0_20 = arith.constant 0 : index
    %c0_21 = arith.constant 0 : index
    %c0_22 = arith.constant 0 : index
    %40 = vector.load %arg4[%c0_20, %c0_21, %c0_22] : memref<8x16x128xbf16, #tpu.memory_space<vmem>>, vector<8x16x128xbf16>
    %cst_23 = arith.constant dense<0.000000e+00> : vector<8x1x128xf32>
    %41 = tpu.matmul %39, %40, %cst_23 {dimension_numbers = #tpu.dot_dimension_numbers<[2], [1], [1], [2], [0, 0, 0, 1, 1, 2], [0], [0]>} : vector<8x1x16xbf16>, vector<8x16x128xbf16>, vector<8x1x128xf32> -> vector<8x1x128xf32>
    %42 = vector.shape_cast %41 : vector<8x1x128xf32> to vector<8x128xf32>
    %c0_24 = arith.constant 0 : index
    %c0_25 = arith.constant 0 : index
    %43 = vector.load %arg1[%c0_24, %c0_25] : memref<8x128xbf16, #tpu.memory_space<vmem>>, vector<8x128xbf16>
    %c0_26 = arith.constant 0 : index
    %c0_27 = arith.constant 0 : index
    %44 = vector.load %arg11[%c0_26, %c0_27] : memref<128x128xbf16, #tpu.memory_space<vmem>>, vector<128x128xbf16>
    %cst_28 = arith.constant dense<0.000000e+00> : vector<8x128xf32>
    %45 = tpu.matmul %43, %44, %cst_28 {dimension_numbers = #tpu.dot_dimension_numbers<[1], [0], [0], [1], [0, 0, 1, 1], [], []>} : vector<8x128xbf16>, vector<128x128xbf16>, vector<8x128xf32> -> vector<8x128xf32>
    %46 = arith.truncf %42 : vector<8x128xf32> to vector<8x128xbf16>
    %c0_29 = arith.constant 0 : index
    %c0_30 = arith.constant 0 : index
    %47 = vector.load %arg12[%c0_29, %c0_30] : memref<128x128xbf16, #tpu.memory_space<vmem>>, vector<128x128xbf16>
    %cst_31 = arith.constant dense<0.000000e+00> : vector<8x128xf32>
    %48 = tpu.matmul %46, %47, %cst_31 {dimension_numbers = #tpu.dot_dimension_numbers<[1], [0], [0], [1], [0, 0, 1, 1], [], []>} : vector<8x128xbf16>, vector<128x128xbf16>, vector<8x128xf32> -> vector<8x128xf32>
    %49 = arith.addf %45, %48 : vector<8x128xf32>
    %c0_32 = arith.constant 0 : index
    %c0_33 = arith.constant 0 : index
    %50 = vector.load %arg13[%c0_32, %c0_33] : memref<1x128xf32, #tpu.memory_space<vmem>>, vector<1x128xf32>
    %51 = vector.broadcast %50 : vector<1x128xf32> to vector<8x128xf32>
    %52 = arith.addf %49, %51 : vector<8x128xf32>
    %cst_34 = arith.constant 0.000000e+00 : f32
    %53 = vector.broadcast %cst_34 : f32 to vector<8x128xf32>
    %54 = arith.maximumf %52, %53 : vector<8x128xf32>
    %c0_35 = arith.constant 0 : index
    %c0_36 = arith.constant 0 : index
    %c0_37 = arith.constant 0 : index
    %55 = vector.load %arg2[%c0_35, %c0_36, %c0_37] : memref<2x8x128xf32, #tpu.memory_space<vmem>>, vector<1x8x128xf32>
    %56 = vector.shape_cast %55 : vector<1x8x128xf32> to vector<8x128xf32>
    %c0_38 = arith.constant 0 : index
    %c0_39 = arith.constant 0 : index
    %c0_40 = arith.constant 0 : index
    %57 = vector.load %arg3[%c0_38, %c0_39, %c0_40] : memref<2x8x128xf32, #tpu.memory_space<vmem>>, vector<1x8x128xf32>
    %58 = vector.shape_cast %57 : vector<1x8x128xf32> to vector<8x128xf32>
    %59 = tpu.concatenate %54, %56 in 1 : vector<8x128xf32>, vector<8x128xf32> -> vector<8x256xf32>
    %60 = arith.truncf %59 : vector<8x256xf32> to vector<8x256xbf16>
    %c0_41 = arith.constant 0 : index
    %c0_42 = arith.constant 0 : index
    %c0_43 = arith.constant 0 : index
    %61 = vector.load %arg14[%c0_41, %c0_42, %c0_43] : memref<2x256x512xbf16, #tpu.memory_space<vmem>>, vector<1x256x512xbf16>
    %62 = vector.shape_cast %61 : vector<1x256x512xbf16> to vector<256x512xbf16>
    %cst_44 = arith.constant dense<0.000000e+00> : vector<8x512xf32>
    %63 = tpu.matmul %60, %62, %cst_44 {dimension_numbers = #tpu.dot_dimension_numbers<[1], [0], [0], [1], [0, 0, 1, 1], [], []>} : vector<8x256xbf16>, vector<256x512xbf16>, vector<8x512xf32> -> vector<8x512xf32>
    %c0_45 = arith.constant 0 : index
    %c0_46 = arith.constant 0 : index
    %c0_47 = arith.constant 0 : index
    %64 = vector.load %arg15[%c0_45, %c0_46, %c0_47] : memref<2x1x512xf32, #tpu.memory_space<vmem>>, vector<1x1x512xf32>
    %65 = vector.shape_cast %64 : vector<1x1x512xf32> to vector<1x512xf32>
    %66 = vector.broadcast %65 : vector<1x512xf32> to vector<8x512xf32>
    %67 = arith.addf %63, %66 : vector<8x512xf32>
    %68 = vector.extract_strided_slice %67 {offsets = [0, 0], sizes = [8, 128], strides = [1, 1]} : vector<8x512xf32> to vector<8x128xf32>
    %69 = arith.negf %68 : vector<8x128xf32>
    %70 = math.exp %69 : vector<8x128xf32>
    %cst_48 = arith.constant 1.000000e+00 : f32
    %71 = vector.broadcast %cst_48 : f32 to vector<8x128xf32>
    %72 = arith.addf %71, %70 : vector<8x128xf32>
    %73 = arith.divf %71, %72 : vector<8x128xf32>
    %74 = vector.extract_strided_slice %67 {offsets = [0, 128], sizes = [8, 128], strides = [1, 1]} : vector<8x512xf32> to vector<8x128xf32>
    %75 = arith.negf %74 : vector<8x128xf32>
    %76 = math.exp %75 : vector<8x128xf32>
    %cst_49 = arith.constant 1.000000e+00 : f32
    %77 = vector.broadcast %cst_49 : f32 to vector<8x128xf32>
    %78 = arith.addf %77, %76 : vector<8x128xf32>
    %79 = arith.divf %77, %78 : vector<8x128xf32>
    %80 = vector.extract_strided_slice %67 {offsets = [0, 256], sizes = [8, 128], strides = [1, 1]} : vector<8x512xf32> to vector<8x128xf32>
    %81 = math.tanh %80 : vector<8x128xf32>
    %82 = vector.extract_strided_slice %67 {offsets = [0, 384], sizes = [8, 128], strides = [1, 1]} : vector<8x512xf32> to vector<8x128xf32>
    %83 = arith.negf %82 : vector<8x128xf32>
    %84 = math.exp %83 : vector<8x128xf32>
    %cst_50 = arith.constant 1.000000e+00 : f32
    %85 = vector.broadcast %cst_50 : f32 to vector<8x128xf32>
    %86 = arith.addf %85, %84 : vector<8x128xf32>
    %87 = arith.divf %85, %86 : vector<8x128xf32>
    %88 = arith.mulf %79, %58 : vector<8x128xf32>
    %89 = arith.mulf %73, %81 : vector<8x128xf32>
    %90 = arith.addf %88, %89 : vector<8x128xf32>
    %91 = math.tanh %90 : vector<8x128xf32>
    %92 = arith.mulf %87, %91 : vector<8x128xf32>
    %c0_51 = arith.constant 0 : index
    %c0_52 = arith.constant 0 : index
    %c0_53 = arith.constant 0 : index
    %93 = vector.load %arg17[%c0_51, %c0_52, %c0_53] : memref<2x8x128xf32, #tpu.memory_space<vmem>>, vector<1x8x128xf32>
    %94 = vector.shape_cast %93 : vector<1x8x128xf32> to vector<8x128xf32>
    %95 = vector.shape_cast %92 : vector<8x128xf32> to vector<1x8x128xf32>
    tpu.vector_store %arg17[%c0_51, %c0_52, %c0_53], %95 {strides = array<i32>} : memref<2x8x128xf32, #tpu.memory_space<vmem>>, vector<1x8x128xf32>,
    %c0_54 = arith.constant 0 : index
    %c0_55 = arith.constant 0 : index
    %c0_56 = arith.constant 0 : index
    %96 = vector.load %arg18[%c0_54, %c0_55, %c0_56] : memref<2x8x128xf32, #tpu.memory_space<vmem>>, vector<1x8x128xf32>
    %97 = vector.shape_cast %96 : vector<1x8x128xf32> to vector<8x128xf32>
    %98 = vector.shape_cast %90 : vector<8x128xf32> to vector<1x8x128xf32>
    tpu.vector_store %arg18[%c0_54, %c0_55, %c0_56], %98 {strides = array<i32>} : memref<2x8x128xf32, #tpu.memory_space<vmem>>, vector<1x8x128xf32>,
    %c1_57 = arith.constant 1 : index
    %c0_58 = arith.constant 0 : index
    %c0_59 = arith.constant 0 : index
    %99 = vector.load %arg2[%c1_57, %c0_58, %c0_59] : memref<2x8x128xf32, #tpu.memory_space<vmem>>, vector<1x8x128xf32>
    %100 = vector.shape_cast %99 : vector<1x8x128xf32> to vector<8x128xf32>
    %c1_60 = arith.constant 1 : index
    %c0_61 = arith.constant 0 : index
    %c0_62 = arith.constant 0 : index
    %101 = vector.load %arg3[%c1_60, %c0_61, %c0_62] : memref<2x8x128xf32, #tpu.memory_space<vmem>>, vector<1x8x128xf32>
    %102 = vector.shape_cast %101 : vector<1x8x128xf32> to vector<8x128xf32>
    %103 = tpu.concatenate %92, %100 in 1 : vector<8x128xf32>, vector<8x128xf32> -> vector<8x256xf32>
    %104 = arith.truncf %103 : vector<8x256xf32> to vector<8x256xbf16>
    %c1_63 = arith.constant 1 : index
    %c0_64 = arith.constant 0 : index
    %c0_65 = arith.constant 0 : index
    %105 = vector.load %arg14[%c1_63, %c0_64, %c0_65] : memref<2x256x512xbf16, #tpu.memory_space<vmem>>, vector<1x256x512xbf16>
    %106 = vector.shape_cast %105 : vector<1x256x512xbf16> to vector<256x512xbf16>
    %cst_66 = arith.constant dense<0.000000e+00> : vector<8x512xf32>
    %107 = tpu.matmul %104, %106, %cst_66 {dimension_numbers = #tpu.dot_dimension_numbers<[1], [0], [0], [1], [0, 0, 1, 1], [], []>} : vector<8x256xbf16>, vector<256x512xbf16>, vector<8x512xf32> -> vector<8x512xf32>
    %c1_67 = arith.constant 1 : index
    %c0_68 = arith.constant 0 : index
    %c0_69 = arith.constant 0 : index
    %108 = vector.load %arg15[%c1_67, %c0_68, %c0_69] : memref<2x1x512xf32, #tpu.memory_space<vmem>>, vector<1x1x512xf32>
    %109 = vector.shape_cast %108 : vector<1x1x512xf32> to vector<1x512xf32>
    %110 = vector.broadcast %109 : vector<1x512xf32> to vector<8x512xf32>
    %111 = arith.addf %107, %110 : vector<8x512xf32>
    %112 = vector.extract_strided_slice %111 {offsets = [0, 0], sizes = [8, 128], strides = [1, 1]} : vector<8x512xf32> to vector<8x128xf32>
    %113 = arith.negf %112 : vector<8x128xf32>
    %114 = math.exp %113 : vector<8x128xf32>
    %cst_70 = arith.constant 1.000000e+00 : f32
    %115 = vector.broadcast %cst_70 : f32 to vector<8x128xf32>
    %116 = arith.addf %115, %114 : vector<8x128xf32>
    %117 = arith.divf %115, %116 : vector<8x128xf32>
    %118 = vector.extract_strided_slice %111 {offsets = [0, 128], sizes = [8, 128], strides = [1, 1]} : vector<8x512xf32> to vector<8x128xf32>
    %119 = arith.negf %118 : vector<8x128xf32>
    %120 = math.exp %119 : vector<8x128xf32>
    %cst_71 = arith.constant 1.000000e+00 : f32
    %121 = vector.broadcast %cst_71 : f32 to vector<8x128xf32>
    %122 = arith.addf %121, %120 : vector<8x128xf32>
    %123 = arith.divf %121, %122 : vector<8x128xf32>
    %124 = vector.extract_strided_slice %111 {offsets = [0, 256], sizes = [8, 128], strides = [1, 1]} : vector<8x512xf32> to vector<8x128xf32>
    %125 = math.tanh %124 : vector<8x128xf32>
    %126 = vector.extract_strided_slice %111 {offsets = [0, 384], sizes = [8, 128], strides = [1, 1]} : vector<8x512xf32> to vector<8x128xf32>
    %127 = arith.negf %126 : vector<8x128xf32>
    %128 = math.exp %127 : vector<8x128xf32>
    %cst_72 = arith.constant 1.000000e+00 : f32
    %129 = vector.broadcast %cst_72 : f32 to vector<8x128xf32>
    %130 = arith.addf %129, %128 : vector<8x128xf32>
    %131 = arith.divf %129, %130 : vector<8x128xf32>
    %132 = arith.mulf %123, %102 : vector<8x128xf32>
    %133 = arith.mulf %117, %125 : vector<8x128xf32>
    %134 = arith.addf %132, %133 : vector<8x128xf32>
    %135 = math.tanh %134 : vector<8x128xf32>
    %136 = arith.mulf %131, %135 : vector<8x128xf32>
    %c1_73 = arith.constant 1 : index
    %c0_74 = arith.constant 0 : index
    %c0_75 = arith.constant 0 : index
    %137 = vector.load %arg17[%c1_73, %c0_74, %c0_75] : memref<2x8x128xf32, #tpu.memory_space<vmem>>, vector<1x8x128xf32>
    %138 = vector.shape_cast %137 : vector<1x8x128xf32> to vector<8x128xf32>
    %139 = vector.shape_cast %136 : vector<8x128xf32> to vector<1x8x128xf32>
    tpu.vector_store %arg17[%c1_73, %c0_74, %c0_75], %139 {strides = array<i32>} : memref<2x8x128xf32, #tpu.memory_space<vmem>>, vector<1x8x128xf32>,
    %c1_76 = arith.constant 1 : index
    %c0_77 = arith.constant 0 : index
    %c0_78 = arith.constant 0 : index
    %140 = vector.load %arg18[%c1_76, %c0_77, %c0_78] : memref<2x8x128xf32, #tpu.memory_space<vmem>>, vector<1x8x128xf32>
    %141 = vector.shape_cast %140 : vector<1x8x128xf32> to vector<8x128xf32>
    %142 = vector.shape_cast %134 : vector<8x128xf32> to vector<1x8x128xf32>
    tpu.vector_store %arg18[%c1_76, %c0_77, %c0_78], %142 {strides = array<i32>} : memref<2x8x128xf32, #tpu.memory_space<vmem>>, vector<1x8x128xf32>,
    %143 = arith.truncf %136 : vector<8x128xf32> to vector<8x128xbf16>
    %c0_79 = arith.constant 0 : index
    %c0_80 = arith.constant 0 : index
    %144 = vector.load %arg16[%c0_79, %c0_80] : memref<8x128xbf16, #tpu.memory_space<vmem>>, vector<8x128xbf16>
    tpu.vector_store %arg16[%c0_79, %c0_80], %143 {strides = array<i32>} : memref<8x128xbf16, #tpu.memory_space<vmem>>, vector<8x128xbf16>,
    return
  }
  func.func @transform_0(%arg0: i32) -> (i32, i32) {
    %c0_i32 = arith.constant 0 : i32
    %c0_i32_0 = arith.constant 0 : i32
    %c0_i32_1 = arith.constant 0 : i32
    return %c0_i32, %c0_i32_0 : i32, i32
  }
  func.func @transform_1(%arg0: i32) -> (i32, i32, i32) {
    %c0_i32 = arith.constant 0 : i32
    %c0_i32_0 = arith.constant 0 : i32
    %c0_i32_1 = arith.constant 0 : i32
    %c0_i32_2 = arith.constant 0 : i32
    return %c0_i32, %c0_i32_0, %c0_i32_1 : i32, i32, i32
  }
  func.func @transform_2(%arg0: i32) -> (i32, i32, i32) {
    %c0_i32 = arith.constant 0 : i32
    %c0_i32_0 = arith.constant 0 : i32
    %c0_i32_1 = arith.constant 0 : i32
    %c0_i32_2 = arith.constant 0 : i32
    return %c0_i32, %c0_i32_0, %c0_i32_1 : i32, i32, i32
  }
  func.func @transform_3(%arg0: i32) -> (i32, i32, i32) {
    %c0_i32 = arith.constant 0 : i32
    %c0_i32_0 = arith.constant 0 : i32
    %c0_i32_1 = arith.constant 0 : i32
    %c0_i32_2 = arith.constant 0 : i32
    return %c0_i32, %c0_i32_0, %c0_i32_1 : i32, i32, i32
  }
  func.func @transform_4(%arg0: i32) -> (i32, i32, i32) {
    %c0_i32 = arith.constant 0 : i32
    %c0_i32_0 = arith.constant 0 : i32
    %c0_i32_1 = arith.constant 0 : i32
    %c0_i32_2 = arith.constant 0 : i32
    return %c0_i32, %c0_i32_0, %c0_i32_1 : i32, i32, i32
  }
  func.func @transform_5(%arg0: i32) -> (i32, i32) {
    %c0_i32 = arith.constant 0 : i32
    %c0_i32_0 = arith.constant 0 : i32
    %c0_i32_1 = arith.constant 0 : i32
    return %c0_i32, %c0_i32_0 : i32, i32
  }
  func.func @transform_6(%arg0: i32) -> (i32, i32) {
    %c0_i32 = arith.constant 0 : i32
    %c0_i32_0 = arith.constant 0 : i32
    %c0_i32_1 = arith.constant 0 : i32
    return %c0_i32, %c0_i32_0 : i32, i32
  }
  func.func @transform_7(%arg0: i32) -> (i32, i32) {
    %c0_i32 = arith.constant 0 : i32
    %c0_i32_0 = arith.constant 0 : i32
    %c0_i32_1 = arith.constant 0 : i32
    return %c0_i32, %c0_i32_0 : i32, i32
  }
  func.func @transform_8(%arg0: i32) -> (i32, i32) {
    %c0_i32 = arith.constant 0 : i32
    %c0_i32_0 = arith.constant 0 : i32
    %c0_i32_1 = arith.constant 0 : i32
    return %c0_i32, %c0_i32_0 : i32, i32
  }
  func.func @transform_9(%arg0: i32) -> i32 {
    %c0_i32 = arith.constant 0 : i32
    %c0_i32_0 = arith.constant 0 : i32
    return %c0_i32 : i32
  }
  func.func @transform_10(%arg0: i32) -> (i32, i32) {
    %c0_i32 = arith.constant 0 : i32
    %c0_i32_0 = arith.constant 0 : i32
    %c0_i32_1 = arith.constant 0 : i32
    return %c0_i32, %c0_i32_0 : i32, i32
  }
  func.func @transform_11(%arg0: i32) -> (i32, i32) {
    %c0_i32 = arith.constant 0 : i32
    %c0_i32_0 = arith.constant 0 : i32
    %c0_i32_1 = arith.constant 0 : i32
    return %c0_i32, %c0_i32_0 : i32, i32
  }
  func.func @transform_12(%arg0: i32) -> (i32, i32) {
    %c0_i32 = arith.constant 0 : i32
    %c0_i32_0 = arith.constant 0 : i32
    %c0_i32_1 = arith.constant 0 : i32
    return %c0_i32, %c0_i32_0 : i32, i32
  }
  func.func @transform_13(%arg0: i32) -> (i32, i32, i32) {
    %c0_i32 = arith.constant 0 : i32
    %c0_i32_0 = arith.constant 0 : i32
    %c0_i32_1 = arith.constant 0 : i32
    %c0_i32_2 = arith.constant 0 : i32
    return %c0_i32, %c0_i32_0, %c0_i32_1 : i32, i32, i32
  }
  func.func @transform_14(%arg0: i32) -> (i32, i32, i32) {
    %c0_i32 = arith.constant 0 : i32
    %c0_i32_0 = arith.constant 0 : i32
    %c0_i32_1 = arith.constant 0 : i32
    %c0_i32_2 = arith.constant 0 : i32
    return %c0_i32, %c0_i32_0, %c0_i32_1 : i32, i32, i32
  }
  func.func @transform_15(%arg0: i32) -> (i32, i32) {
    %c0_i32 = arith.constant 0 : i32
    %c0_i32_0 = arith.constant 0 : i32
    %c0_i32_1 = arith.constant 0 : i32
    return %c0_i32, %c0_i32_0 : i32, i32
  }
  func.func @transform_16(%arg0: i32) -> (i32, i32, i32) {
    %c0_i32 = arith.constant 0 : i32
    %c0_i32_0 = arith.constant 0 : i32
    %c0_i32_1 = arith.constant 0 : i32
    %c0_i32_2 = arith.constant 0 : i32
    return %c0_i32, %c0_i32_0, %c0_i32_1 : i32, i32, i32
  }
  func.func @transform_17(%arg0: i32) -> (i32, i32, i32) {
    %c0_i32 = arith.constant 0 : i32
    %c0_i32_0 = arith.constant 0 : i32
    %c0_i32_1 = arith.constant 0 : i32
    %c0_i32_2 = arith.constant 0 : i32
    return %c0_i32, %c0_i32_0, %c0_i32_1 : i32, i32, i32
  }
  func.func @transform_18(%arg0: i32) -> (i32, i32) {
    %c0_i32 = arith.constant 0 : i32
    %c0_i32_0 = arith.constant 0 : i32
    %c0_i32_1 = arith.constant 0 : i32
    return %c0_i32, %c0_i32_0 : i32, i32
  }
}

</mosaic_0001>

<bundles_post_ra>
// kernel: tpu_custom_call.1
= control target key start
LH: loop header
LB: loop body
LE: loop exit
PB: predicated region body
PF: predicated region fallthrough
CT: control target
= control target key end

     0   :  { %s3993_s0 = inlined_call_operand.hbm [shape: bf16[8,128], index: 0, kind: input, shape index: {}]   ;;  %s3994_s1 = inlined_call_operand.hbm [shape: f32[2,8,128], index: 1, kind: input, shape index: {}]   ;;  %s3995_s2 = inlined_call_operand.hbm [shape: f32[2,8,128], index: 2, kind: input, shape index: {}]   ;;  %s3996_s3 = inlined_call_operand.hbm [shape: bf16[8,16,128], index: 3, kind: input, shape index: {}]   ;;  %s3997_s4 = inlined_call_operand.hbm [shape: bf16[8,16,128], index: 4, kind: input, shape index: {}]   ;;  %s3998_s5 = inlined_call_operand.vmem [shape: f32[8,16], index: 5, kind: input, shape index: {}]   ;;  %s3999_s6 = inlined_call_operand.hbm [shape: bf16[128,128], index: 6, kind: input, shape index: {}]   ;;  %s4000_s7 = inlined_call_operand.vmem [shape: f32[1,128], index: 7, kind: input, shape index: {}]   ;;  %s4001_s8 = inlined_call_operand.vmem [shape: f32[1,128], index: 8, kind: input, shape index: {}]   ;;  %s4002_s9 = inlined_call_operand.<no memory space> [shape: f32[1], index: 9, kind: input, shape index: {}]   ;;  %s4003_s10 = inlined_call_operand.hbm [shape: bf16[128,128], index: 10, kind: input, shape index: {}]   ;;  %s4004_s11 = inlined_call_operand.hbm [shape: bf16[128,128], index: 11, kind: input, shape index: {}]   ;;  %s4005_s12 = inlined_call_operand.vmem [shape: f32[1,128], index: 12, kind: input, shape index: {}]   ;;  %s4006_s13 = inlined_call_operand.hbm [shape: bf16[2,256,512], index: 13, kind: input, shape index: {}]   ;;  %s4007_s14 = inlined_call_operand.vmem [shape: f32[2,1,512], index: 14, kind: input, shape index: {}]   ;;  %s4008_s15 = inlined_call_operand.hbm [shape: bf16[8,128], index: 15, kind: output, shape index: {0}]   ;;  %s4009_s16 = inlined_call_operand.hbm [shape: f32[2,8,128], index: 16, kind: output, shape index: {1}]   ;;  %s4010_s17 = inlined_call_operand.hbm [shape: f32[2,8,128], index: 17, kind: output, shape index: {2}]   ;;  %s4011_s18 = inlined_call_operand.hbm [shape: f32[8,16], index: 18, kind: output, shape index: {3}]  }
   0x1   :  { %4020 = sst [smem:[#allocation32_spill]] %s3993_s0 }
   0x2   :  { %4021 = sst [smem:[#allocation33_spill]] %s3994_s1 }
   0x3   :  { %4022 = sst [smem:[#allocation34_spill]] %s3995_s2 }
   0x4   :  { %4023 = sst [smem:[#allocation35_spill]] %s4008_s15 }
   0x5   :  { %25 = vsyncpa [#allocation4], 0 }
   0x6   :  { %26 = vsyncpa [#allocation7], 0 }
   0x7   :  { %27 = vsyncpa [#allocation10], 0 }
   0x8   :  { %28 = vsyncpa [#allocation13], 0 }
   0x9   :  { %29 = vsyncpa [#allocation16], 0 }
   0xa   :  { %30 = vsyncpa [#allocation5], 0 }
   0xb   :  { %31 = vsyncpa [#allocation20], 0 }
   0xc   :  { %32 = vsyncpa [#allocation23], 0  ;;  %s3478_s27 = smov [#allocation6]   ;;  %s4024_s0 = sld [smem:[#allocation33_spill]] }
   0xd   :  { %s48_s28 = sshll.u32 %s3478_s27, 4  ;;  %s49_s28 = int_to_ptr.vmem [resolvable:$true] %s48_s28 }
  0x12   :  { %s3176_s19 = scalar_lea.hbm %s4024_s0, 256 }
  0x13   :  { %p3177_p0 = scmp.ne.s32.totalorder %s4024_s0, %s3176_s19  ;;  %p3180_p1 = scmp.lt.u32.totalorder %s3176_s19, %s4024_s0 }
  0x15   :  { %p3182_p2 = pnand %p3180_p1, %p3177_p0 }
  0x17   :  { %3185 = shalt.err (!%p3182_p2)
}
  0x18   :  { %s3186_s2 = scalar_lea.vmem %s49_s28, 256  ;;  %p3191_p4 = scmp.lt.s32.totalorder %s49_s28, %s49_s28 }
  0x19   :  { %p3187_p3 = scmp.ne.s32.totalorder %s49_s28, %s3186_s2  ;;  %p3192_p5 = scmp.lt.s32.totalorder %s3186_s2, %s3186_s2 }
  0x1b   :  { %p3193_p6 = por %p3192_p5, %p3191_p4 }
  0x1d   :  { %p3194_p7 = pnand %p3193_p6, %p3187_p3 }
  0x1f   :  { %3197 = shalt.err (!%p3194_p7)
}
  0x20   :  { %s4016_s23 = smov 128   ;;  %s4018_s24 = smov 8  }
  0x21   :  { %54 = dma.hbm_to_vmem [thread:$0]  %s4024_s0, 256, %s49_s28, [#allocation7], %s4016_s23, %s4016_s23, %s4018_s24  }
  0x22   :  { %s3481_s27 = smov [#allocation9]   ;;  %s3198_s1 = scalar_lea.hbm %s3996_s3, 1024 }
  0x23   :  { %s72_s29 = sshll.u32 %s3481_s27, 4  ;;  %p3199_p8 = scmp.ne.s32.totalorder %s3996_s3, %s3198_s1  ;;  %s73_s29 = int_to_ptr.vmem [resolvable:$true] %s72_s29 }
  0x24   :  { %p3202_p9 = scmp.lt.u32.totalorder %s3198_s1, %s3996_s3 }
  0x26   :  { %p3204_p10 = pnand %p3202_p9, %p3199_p8 }
  0x28   :  { %3207 = shalt.err (!%p3204_p10)
}
  0x29   :  { %s3208_s15 = scalar_lea.vmem %s73_s29, 1024  ;;  %p3213_p12 = scmp.lt.s32.totalorder %s73_s29, %s73_s29 }
  0x2a   :  { %p3209_p11 = scmp.ne.s32.totalorder %s73_s29, %s3208_s15  ;;  %p3214_p13 = scmp.lt.s32.totalorder %s3208_s15, %s3208_s15 }
  0x2c   :  { %p3215_p0 = por %p3214_p13, %p3213_p12 }
  0x2e   :  { %p3216_p1 = pnand %p3215_p0, %p3209_p11 }
  0x30   :  { %3219 = shalt.err (!%p3216_p1)
}
  0x31   :  { %s3482_s28 = smov 64   ;;  %s3483_s0 = smov 4  }
  0x32   :  { %78 = dma.hbm_to_vmem [thread:$0]  %s3996_s3, 1024, %s73_s29, [#allocation10], %s3482_s28, %s3482_s28, %s3483_s0  }
  0x33   :  { %s3484_s27 = smov [#allocation12]   ;;  %s3485_s19 = smov [#allocation15]  }
  0x34   :  { %s98_s30 = sshll.u32 %s3484_s27, 4  ;;  %s128_s1 = sshll.u32 %s3485_s19, 4  ;;  %s99_s30 = int_to_ptr.vmem [resolvable:$true] %s98_s30  ;;  %s3625_s1 = int_to_ptr.vmem [resolvable:$true] %s128_s1 }
  0x35   :  { %s3220_s21 = scalar_lea.hbm %s3999_s6, 1024 }
  0x36   :  { %p3221_p2 = scmp.ne.s32.totalorder %s3999_s6, %s3220_s21  ;;  %p3224_p3 = scmp.lt.u32.totalorder %s3220_s21, %s3999_s6 }
  0x38   :  { %p3226_p4 = pnand %p3224_p3, %p3221_p2 }
  0x3a   :  { %3229 = shalt.err (!%p3226_p4)
}
  0x3b   :  { %s3230_s3 = scalar_lea.vmem %s99_s30, 1024  ;;  %p3235_p6 = scmp.lt.s32.totalorder %s99_s30, %s99_s30 }
  0x3c   :  { %p3231_p5 = scmp.ne.s32.totalorder %s99_s30, %s3230_s3  ;;  %p3236_p7 = scmp.lt.s32.totalorder %s3230_s3, %s3230_s3 }
  0x3e   :  { %p3237_p8 = por %p3236_p7, %p3235_p6 }
  0x40   :  { %p3238_p9 = pnand %p3237_p8, %p3231_p5 }
  0x42   :  { %3241 = shalt.err (!%p3238_p9)
}
  0x43   :  { %104 = dma.hbm_to_vmem [thread:$0]  %s3999_s6, 1024, %s99_s30, [#allocation13], %s3482_s28, %s3482_s28, %s3483_s0  }
  0x44   :  { %s3242_s23 = scalar_lea.hbm %s4004_s11, 1024 }
  0x45   :  { %p3243_p10 = scmp.ne.s32.totalorder %s4004_s11, %s3242_s23  ;;  %p3246_p11 = scmp.lt.u32.totalorder %s3242_s23, %s4004_s11 }
  0x47   :  { %p3248_p12 = pnand %p3246_p11, %p3243_p10 }
  0x49   :  { %3251 = shalt.err (!%p3248_p12)
}
  0x4a   :  { %s3252_s21 = scalar_lea.vmem %s3625_s1, 1024  ;;  %p3257_p0 = scmp.lt.s32.totalorder %s3625_s1, %s3625_s1 }
  0x4b   :  { %p3253_p13 = scmp.ne.s32.totalorder %s3625_s1, %s3252_s21  ;;  %p3258_p1 = scmp.lt.s32.totalorder %s3252_s21, %s3252_s21 }
  0x4d   :  { %p3259_p2 = por %p3258_p1, %p3257_p0 }
  0x4f   :  { %p3260_p3 = pnand %p3259_p2, %p3253_p13 }
  0x51   :  { %3263 = shalt.err (!%p3260_p3)
}
  0x52   :  { %134 = dma.hbm_to_vmem [thread:$0]  %s4004_s11, 1024, %s3625_s1, [#allocation16], %s3482_s28, %s3482_s28, %s3483_s0  }
  0x53   :  { %s3486_s22 = smov [#allocation3]   ;;  %s3487_s3 = smov [#allocation8]  }
  0x54   :  { %s39_s2 = sshll.u32 %s3486_s22, 4  ;;  %s60_s29 = sshll.u32 %s3487_s3, 4  ;;  %s40_s2 = int_to_ptr.vmem [resolvable:$true] %s39_s2  ;;  %s3662_s29 = int_to_ptr.vmem [resolvable:$true] %s60_s29 }
  0x55   :  { %s4025_s27 = sld [smem:[#allocation32_spill]] }
  0x5b   :  { %s3264_s23 = scalar_lea.hbm %s4025_s27, 64 }
  0x5c   :  { %p3265_p4 = scmp.ne.s32.totalorder %s4025_s27, %s3264_s23  ;;  %p3268_p5 = scmp.lt.u32.totalorder %s3264_s23, %s4025_s27 }
  0x5e   :  { %p3270_p6 = pnand %p3268_p5, %p3265_p4 }
  0x60   :  { %3273 = shalt.err (!%p3270_p6)
}
  0x61   :  { %s3274_s11 = scalar_lea.vmem %s40_s2, 64  ;;  %p3279_p8 = scmp.lt.s32.totalorder %s40_s2, %s40_s2 }
  0x62   :  { %p3275_p7 = scmp.ne.s32.totalorder %s40_s2, %s3274_s11  ;;  %p3280_p9 = scmp.lt.s32.totalorder %s3274_s11, %s3274_s11 }
  0x64   :  { %p3281_p10 = por %p3280_p9, %p3279_p8 }
  0x66   :  { %p3282_p11 = pnand %p3281_p10, %p3275_p7 }
  0x68   :  { %3285 = shalt.err (!%p3282_p11)
}
  0x69   :  { %42 = dma.hbm_to_vmem [thread:$0]  %s4025_s27, 64, %s40_s2, [#allocation4]  }
  0x6a   :  { %s4026_s22 = sld [smem:[#allocation34_spill]] }
  0x70   :  { %s3286_s3 = scalar_lea.hbm %s4026_s22, 256 }
  0x71   :  { %p3287_p12 = scmp.ne.s32.totalorder %s4026_s22, %s3286_s3  ;;  %p3290_p13 = scmp.lt.u32.totalorder %s3286_s3, %s4026_s22 }
  0x73   :  { %p3292_p0 = pnand %p3290_p13, %p3287_p12 }
  0x75   :  { %3295 = shalt.err (!%p3292_p0)
}
  0x76   :  { %s3296_s19 = scalar_lea.vmem %s3662_s29, 256  ;;  %p3301_p2 = scmp.lt.s32.totalorder %s3662_s29, %s3662_s29 }
  0x77   :  { %p3297_p1 = scmp.ne.s32.totalorder %s3662_s29, %s3296_s19  ;;  %p3302_p3 = scmp.lt.s32.totalorder %s3296_s19, %s3296_s19 }
  0x79   :  { %p3303_p4 = por %p3302_p3, %p3301_p2 }
  0x7b   :  { %p3304_p5 = pnand %p3303_p4, %p3297_p1 }
  0x7d   :  { %3307 = shalt.err (!%p3304_p5)
}
  0x7e   :  { %s4027_s2 = smov 8   ;;  %s4028_s27 = smov 128  }
  0x7f   :  { %66 = dma.hbm_to_vmem [thread:$0]  %s4026_s22, 256, %s3662_s29, [#allocation7], %s4028_s27, %s4028_s27, %s4027_s2  }
  0x80   :  { %s3488_s11 = smov [#allocation11]   ;;  %s3489_s21 = smov [#allocation14]  }
  0x81   :  { %s84_s1 = sshll.u32 %s3488_s11, 4  ;;  %s116_s6 = sshll.u32 %s3489_s21, 4  ;;  %s85_s1 = int_to_ptr.vmem [resolvable:$true] %s84_s1  ;;  %s3696_s6 = int_to_ptr.vmem [resolvable:$true] %s116_s6 }
  0x82   :  { %s3308_s25 = scalar_lea.hbm %s3997_s4, 1024 }
  0x83   :  { %p3309_p6 = scmp.ne.s32.totalorder %s3997_s4, %s3308_s25  ;;  %p3312_p7 = scmp.lt.u32.totalorder %s3308_s25, %s3997_s4 }
  0x85   :  { %p3314_p8 = pnand %p3312_p7, %p3309_p6 }
  0x87   :  { %3317 = shalt.err (!%p3314_p8)
}
  0x88   :  { %s3318_s29 = scalar_lea.vmem %s85_s1, 1024  ;;  %p3323_p10 = scmp.lt.s32.totalorder %s85_s1, %s85_s1 }
  0x89   :  { %p3319_p9 = scmp.ne.s32.totalorder %s85_s1, %s3318_s29  ;;  %p3324_p11 = scmp.lt.s32.totalorder %s3318_s29, %s3318_s29 }
  0x8b   :  { %p3325_p12 = por %p3324_p11, %p3323_p10 }
  0x8d   :  { %p3326_p13 = pnand %p3325_p12, %p3319_p9 }
  0x8f   :  { %3329 = shalt.err (!%p3326_p13)
}
  0x90   :  { %90 = dma.hbm_to_vmem [thread:$0]  %s3997_s4, 1024, %s85_s1, [#allocation10], %s3482_s28, %s3482_s28, %s3483_s0  }
  0x91   :  { %s3330_s21 = scalar_lea.hbm %s4003_s10, 1024 }
  0x92   :  { %p3331_p0 = scmp.ne.s32.totalorder %s4003_s10, %s3330_s21  ;;  %p3334_p1 = scmp.lt.u32.totalorder %s3330_s21, %s4003_s10 }
  0x94   :  { %p3336_p2 = pnand %p3334_p1, %p3331_p0 }
  0x96   :  { %3339 = shalt.err (!%p3336_p2)
}
  0x97   :  { %s3340_s23 = scalar_lea.vmem %s3696_s6, 1024  ;;  %p3345_p4 = scmp.lt.s32.totalorder %s3696_s6, %s3696_s6 }
  0x98   :  { %p3341_p3 = scmp.ne.s32.totalorder %s3696_s6, %s3340_s23  ;;  %p3346_p5 = scmp.lt.s32.totalorder %s3340_s23, %s3340_s23 }
  0x9a   :  { %p3347_p6 = por %p3346_p5, %p3345_p4 }
  0x9c   :  { %p3348_p7 = pnand %p3347_p6, %p3341_p3 }
  0x9e   :  { %3351 = shalt.err (!%p3348_p7)
}
  0x9f   :  { %122 = dma.hbm_to_vmem [thread:$0]  %s4003_s10, 1024, %s3696_s6, [#allocation13], %s3482_s28, %s3482_s28, %s3483_s0  }
  0xa0   :  { %s3490_s24 = smov [#allocation17]   ;;  %s3352_s15 = scalar_lea.hbm %s4006_s13, 16384 }
  0xa1   :  { %s142_s19 = sshll.u32 %s3490_s24, 4  ;;  %p3353_p8 = scmp.ne.s32.totalorder %s4006_s13, %s3352_s15  ;;  %s143_s19 = int_to_ptr.vmem [resolvable:$true] %s142_s19 }
  0xa2   :  { %p3356_p9 = scmp.lt.u32.totalorder %s3352_s15, %s4006_s13 }
  0xa4   :  { %p3358_p10 = pnand %p3356_p9, %p3353_p8 }
  0xa6   :  { %3361 = shalt.err (!%p3358_p10)
}
  0xa7   :  { %s3362_s3 = scalar_lea.vmem %s143_s19, 16384  ;;  %p3367_p12 = scmp.lt.s32.totalorder %s143_s19, %s143_s19 }
  0xa8   :  { %p3363_p11 = scmp.ne.s32.totalorder %s143_s19, %s3362_s3  ;;  %p3368_p13 = scmp.lt.s32.totalorder %s3362_s3, %s3362_s3 }
  0xaa   :  { %p3369_p0 = por %p3368_p13, %p3367_p12 }
  0xac   :  { %p3370_p1 = pnand %p3369_p0, %p3363_p11 }
  0xae   :  { %3373 = shalt.err (!%p3370_p1)
}
  0xaf   :  { %s3491_s10 = smov 256   ;;  %s3492_s28 = smov 16  }
  0xb0   :  { %148 = dma.hbm_to_vmem [thread:$0]  %s4006_s13, 16384, %s143_s19, [#allocation16], %s3491_s10, %s3491_s10, %s3492_s28  }
  0xb1   :  { %3462 = dma.done.wait [#allocation4], 64  }
  0xb2   :  { %3463 = vsyncadd [#allocation4], 4294967232 }
  0xb3   :  { %3464 = dma.done.wait [#allocation7], 512  }
  0xb4   :  { %3465 = vsyncadd [#allocation7], 4294966784 }
  0xb5   :  { %3466 = dma.done.wait [#allocation10], 2048  }
  0xb6   :  { %3467 = vsyncadd [#allocation10], 4294965248 }
  0xb7   :  { %3468 = dma.done.wait [#allocation13], 2048  }
  0xb8   :  { %3469 = vsyncadd [#allocation13], 4294965248 }
  0xb9   :  { %3470 = dma.done.wait [#allocation16], 17408  }
  0xba   :  { %3471 = vsyncadd [#allocation16], 4294949888  ;;  %v3493_v0 = vmov 0.0   ;;  %vm3494_vm0 = vmmov 0   ;;  %v2884_v1 = vld [vmem:[#allocation12] sm:$0xff]   ;;  %v2885_v2 = vld [vmem:[#allocation12 + $0x8] sm:$0xff]   ;;  %v330_v13 = vlaneseq }
  0xbb   :  { %2754 = vmatprep.subr.bf16.mxu0 %v3493_v0  ;;  %2770 = vmatprep.mubr.msk.bf16.mxu0 %vm3494_vm0, %v3493_v0  ;;  %v2886_v3 = vld [vmem:[#allocation12 + $0x10] sm:$0xff]   ;;  %v2887_v4 = vld [vmem:[#allocation12 + $0x18] sm:$0xff]   ;;  %v2888_v5 = vld [vmem:[#allocation12 + $0x20] sm:$0xff]   ;;  %v3495_v11 = vmov 1966171168   ;;  %vm549_vm1 = vcmask 130112  }
  0xbc   :  { %2774 = vmatprep.subr.bf16.mxu1 %v3493_v0  ;;  %2776 = vmatprep.mubr.msk.bf16.mxu1 %vm3494_vm0, %v3493_v0  ;;  %v2889_v6 = vld [vmem:[#allocation12 + $0x28] sm:$0xff]   ;;  %v2890_v7 = vld [vmem:[#allocation12 + $0x30] sm:$0xff]   ;;  %v2891_v8 = vld [vmem:[#allocation12 + $0x38] sm:$0xff]   ;;  %v328_v12 = vunpack.c.l.s4 %v3495_v11  ;;  %v3762_v15 = vshrl.u32 %v330_v13, 7  ;;  %vm614_vm2 = vcmask 1041409   ;;  %vm616_vm3 = vcmask 1042434  }
  0xbd   :  { %2755 = vmatpush3.bf16.msra.mxu0 %v2884_v1  ;;  %v180_v9 = vld [vmem:[#allocation6 + $0x8] sm:$0xff]  ;;  %v2490_v16 = vld [vmem:[%s4000_s7] ss:$0 sm:$0xff]  ;;  %v2673_v24 = vld [vmem:[#allocation11] sm:$0xff]   ;;  %vm618_vm4 = vcmask 1043459   ;;  %vm620_vm5 = vcmask 1044484  }
  0xbe   :  { %2756 = vmatprep.subr.bf16.mxu0 %v3493_v0  ;;  %v181_v10 = vpack.c.bf16 %v180_v9, %v180_v9  ;;  %v329_v14 = vunpack.c.0.s8 %v328_v12  ;;  %v3772_v25 = vsub.s32 0, %v3762_v15  ;;  %v2674_v29 = vunpack.c.l.bf16 %v2673_v24  ;;  %v2705_v34 = vld [vmem:[#allocation11 + $0x10] sm:$0xff]   ;;  %v2704_v36 = vld [vmem:[#allocation11 + $0x8] sm:$0xff]   ;;  %v2707_v39 = vld [vmem:[#allocation11 + $0x20] sm:$0xff]   ;;  %s3496_s19 = smov [#allocation22]  }
  0xbf   :  { %v2675_v31 = vunpack.c.h.bf16 %v2673_v24  ;;  %v2682_v38 = vunpack.c.l.bf16 %v2705_v34  ;;  %v2678_v43 = vunpack.c.l.bf16 %v2704_v36  ;;  %v2679_v45 = vunpack.c.h.bf16 %v2704_v36  ;;  %v2706_v48 = vld [vmem:[#allocation11 + $0x18] sm:$0xff]   ;;  %v2708_v56 = vld [vmem:[#allocation11 + $0x28] sm:$0xff]   ;;  %s2466_s29 = sshll.u32 %s3496_s19, 4  ;;  %s2467_s29 = int_to_ptr.vmem [resolvable:$true] %s2466_s29 }
  0xc0   :  { %v3768_v17 = vsub.s32 %v329_v14, %v3762_v15  ;;  %v2690_v46 = vunpack.c.l.bf16 %v2707_v39  ;;  %v2683_v53 = vunpack.c.h.bf16 %v2705_v34  ;;  %v2686_v54 = vunpack.c.l.bf16 %v2706_v48  ;;  %v3787_v60 = vld [vmem:[%s4001_s8] ss:$0 sm:$0xff]  ;;  %s3374_s22 = scalar_lea.vmem %s2467_s29, 128  ;;  %p3379_p3 = scmp.lt.s32.totalorder %s2467_s29, %s2467_s29 }
  0xc1   :  { %2757 = vmatpush3.bf16.msra.mxu0 %v2885_v2  ;;  %v2691_v61 = vunpack.c.h.bf16 %v2707_v39  ;;  %v2694_v62 = vunpack.c.l.bf16 %v2708_v56  ;;  %v2709_v2 = vld [vmem:[#allocation11 + $0x30] sm:$0xff]   ;;  %vm622_vm6 = vcmask 1045509   ;;  %vm624_vm7 = vcmask 1046534   ;;  %p3375_p2 = scmp.ne.s32.totalorder %s2467_s29, %s3374_s22  ;;  %p3380_p4 = scmp.lt.s32.totalorder %s3374_s22, %s3374_s22 }
  0xc2   :  { %2758 = vmatprep.subr.bf16.mxu0 %v3493_v0  ;;  %v2698_v9 = vunpack.c.l.bf16 %v2709_v2  ;;  %vm626_vm8 = vcmask 1047559   ;;  %vm630_vm10 = vcmask 130048  }
  0xc3   :  { %p3381_p5 = por %p3380_p4, %p3379_p3 }
  0xc5   :  { %2759 = vmatpush3.bf16.msra.mxu0 %v2886_v3  ;;  %p3382_p6 = pnand %p3381_p5, %p3375_p2 }
  0xc6   :  { %2760 = vmatprep.subr.bf16.mxu0 %v3493_v0 }
  0xc9   :  { %2761 = vmatpush3.bf16.msra.mxu0 %v2887_v4 }
  0xca   :  { %2762 = vmatprep.subr.bf16.mxu0 %v3493_v0 }
  0xcd   :  { %2763 = vmatpush3.bf16.msra.mxu0 %v2888_v5 }
  0xce   :  { %2764 = vmatprep.subr.bf16.mxu0 %v3493_v0 }
  0xd1   :  { %2765 = vmatpush3.bf16.msra.mxu0 %v2889_v6 }
  0xd2   :  { %2766 = vmatprep.subr.bf16.mxu0 %v3493_v0 }
  0xd5   :  { %2767 = vmatpush3.bf16.msra.mxu0 %v2890_v7 }
  0xd6   :  { %2768 = vmatprep.subr.bf16.mxu0 %v3493_v0 }
  0xd9   :  { %2769 = vmatpush3.bf16.msra.mxu0 %v2891_v8  ;;  %v2687_v8 = vunpack.c.h.bf16 %v2706_v48 }
  0xda   :  { %2804 = vmatprep.subr.bf16.mxu0 %v3493_v0 }
  0xdc   :  { %2771 = vmatmul.mubr.bf16.vlgmr.msra.gmra.mrb[0].mxu0 %v181_v10 }
  0xdd   :  { %2806 = vmatprep.mubr.msk.bf16.mxu0 %vm3494_vm0, %v3493_v0 }
 0x1af   :  { %v287_v18 = vpop.f32.mrb[0].mxu0 }
 0x1b0   :  { %v288_v19 = vadd.f32 %v2490_v16, %v287_v18  ;;  %v2772_v20 = vpop.f32.mrb[1].mxu0  ;;  %v2710_v16 = vld [vmem:[#allocation11 + $0x38] sm:$0xff]  }
 0x1b1   :  { %v290_v21 = vpop.f32.mrb[2].mxu0  ;;  %v2703_v39 = vunpack.c.h.bf16 %v2710_v16 }
 0x1b2   :  { %v333_v22 = vrot.slane %v288_v19, %v3768_v17  ;;  %v2773_v23 = vpop.f32.mrb[3].mxu0  ;;  %v326_v26 = vcombine.high %v288_v19, %v288_v19  ;;  %v2695_v21 = vunpack.c.h.bf16 %v2708_v56 }
 0x1b3   :  { %v2702_v23 = vunpack.c.l.bf16 %v2710_v16 }
 0x1b4   :  { %v349_v27 = vrot.slane %v333_v22, %v3768_v17  ;;  %v341_v28 = vcombine.high %v333_v22, %v333_v22  ;;  %v340_v32 = vrot.slane %v326_v26, %v3768_v17 }
 0x1b6   :  { %v378_v30 = vrot.slane %v349_v27, %v3772_v25  ;;  %v371_v33 = vcombine.high %v349_v27, %v349_v27  ;;  %v363_v35 = vrot.slane %v341_v28, %v3768_v17  ;;  %v356_v40 = vrot.slane %v340_v32, %v3768_v17 }
 0x1b7   :  { %v342_v47 = vcombine.high %v340_v32, %v340_v32 }
 0x1b8   :  { %v415_v37 = vadd.f32 %v2674_v29, %v378_v30  ;;  %v386_v41 = vrot.slane %v371_v33, %v3772_v25  ;;  %v416_v42 = vadd.f32 %v2675_v31, %v378_v30  ;;  %v382_v44 = vrot.slane %v363_v35, %v3772_v25 }
 0x1b9   :  { %v373_v49 = vcombine.high %v363_v35, %v363_v35  ;;  %v394_v50 = vrot.slane %v356_v40, %v3772_v25  ;;  %v370_v57 = vrot.slane %v342_v47, %v3768_v17  ;;  %v372_v3 = vcombine.high %v356_v40, %v356_v40 }
 0x1ba   :  { %3108 = vtanh.f32 %v415_v37  ;;  %v419_v51 = vadd.f32 %v2682_v38, %v386_v41  ;;  %v417_v52 = vadd.f32 %v2678_v43, %v382_v44  ;;  %v418_v55 = vadd.f32 %v2679_v45, %v382_v44 }
 0x1bb   :  { %3110 = vtanh.f32 %v416_v42  ;;  %v390_v58 = vrot.slane %v373_v49, %v3772_v25  ;;  %v423_v59 = vadd.f32 %v2690_v46, %v394_v50  ;;  %v420_v63 = vadd.f32 %v2683_v53, %v386_v41 }
 0x1bc   :  { %3112 = vtanh.f32 %v419_v51  ;;  %v398_v4 = vrot.slane %v370_v57, %v3772_v25  ;;  %v424_v10 = vadd.f32 %v2691_v61, %v394_v50  ;;  %v374_v11 = vcombine.high %v370_v57, %v370_v57 }
 0x1bd   :  { %3114 = vtanh.f32 %v417_v52  ;;  %v421_v5 = vadd.f32 %v2686_v54, %v390_v58  ;;  %v402_v12 = vrot.slane %v372_v3, %v3772_v25  ;;  %v422_v22 = vadd.f32 %v2687_v8, %v390_v58 }
 0x1be   :  { %3116 = vtanh.f32 %v418_v55  ;;  %v425_v14 = vadd.f32 %v2694_v62, %v398_v4  ;;  %v406_v24 = vrot.slane %v374_v11, %v3772_v25  ;;  %v2699_v31 = vunpack.c.h.bf16 %v2709_v2 }
 0x1bf   :  { %3118 = vtanh.f32 %v423_v59  ;;  %v427_v26 = vadd.f32 %v2698_v9, %v402_v12  ;;  %v426_v32 = vadd.f32 %v2695_v21, %v398_v4  ;;  %v503_v9 = vstv %s4002_s9 }
 0x1c0   :  { %3120 = vtanh.f32 %v420_v63  ;;  %v429_v34 = vadd.f32 %v2702_v23, %v406_v24  ;;  %v428_v38 = vadd.f32 %v2699_v31, %v402_v12  ;;  %v430_v44 = vadd.f32 %v2703_v39, %v406_v24 }
 0x1c1   :  { %3122 = vtanh.f32 %v421_v5  ;;  %v539_v5 = vand.u32 127, %v330_v13 }
 0x1c2   :  { %3124 = vtanh.f32 %v424_v10 }
 0x1c3   :  { %3126 = vtanh.f32 %v425_v14  ;;  %v542_v21 = vsub.s32 %v539_v5, %v3762_v15 }
 0x1c4   :  { %v3109_v1 = vpop.eup %3108  ;;  %3128 = vtanh.f32 %v422_v22 }
 0x1c5   :  { %v454_v6 = vmul.f32 %v3109_v1, %v3787_v60  ;;  %v3111_v7 = vpop.eup %3110  ;;  %3130 = vtanh.f32 %v427_v26 }
 0x1c6   :  { %v455_v18 = vmul.f32 %v3111_v7, %v3787_v60  ;;  %v3113_v19 = vpop.eup %3112  ;;  %3132 = vtanh.f32 %v426_v32  ;;  %v544_v7 = vadd.s32 4294967288, %v539_v5 }
 0x1c7   :  { %470 = vadd.xlane.f32.xlu0 %v454_v6  ;;  %v3115_v20 = vpop.eup %3114  ;;  %v458_v29 = vmul.f32 %v3113_v19, %v3787_v60  ;;  %3134 = vtanh.f32 %v429_v34 }
 0x1c8   :  { %v456_v27 = vmul.f32 %v3115_v20, %v3787_v60  ;;  %v3117_v28 = vpop.eup %3116  ;;  %3136 = vtanh.f32 %v428_v38  ;;  %v547_v14 = vsub.s32 %v544_v7, %v3762_v15 }
 0x1c9   :  { %v3119_v30 = vpop.eup %3118  ;;  %v457_v33 = vmul.f32 %v3117_v28, %v3787_v60  ;;  %3138 = vtanh.f32 %v430_v44 }
 0x1ca   :  { %474 = vadd.xlane.f32.xlu1 %v456_v27  ;;  %v3121_v35 = vpop.eup %3120  ;;  %v462_v36 = vmul.f32 %v3119_v30, %v3787_v60 }
 0x1cb   :  { %472 = vadd.xlane.f32.xlu0 %v455_v18  ;;  %v3123_v37 = vpop.eup %3122  ;;  %v459_v40 = vmul.f32 %v3121_v35, %v3787_v60 }
 0x1cc   :  { %v3125_v41 = vpop.eup %3124  ;;  %v460_v42 = vmul.f32 %v3123_v37, %v3787_v60 }
 0x1cd   :  { %v3127_v43 = vpop.eup %3126  ;;  %v463_v45 = vmul.f32 %v3125_v41, %v3787_v60 }
 0x1ce   :  { %476 = vadd.xlane.f32.xlu1 %v457_v33  ;;  %v3129_v46 = vpop.eup %3128  ;;  %v464_v47 = vmul.f32 %v3127_v43, %v3787_v60 }
 0x1cf   :  { %478 = vadd.xlane.f32.xlu0 %v458_v29  ;;  %v3131_v48 = vpop.eup %3130  ;;  %v461_v49 = vmul.f32 %v3129_v46, %v3787_v60 }
 0x1d0   :  { %v3133_v50 = vpop.eup %3132  ;;  %v466_v51 = vmul.f32 %v3131_v48, %v3787_v60 }
 0x1d1   :  { %v3135_v52 = vpop.eup %3134  ;;  %v465_v53 = vmul.f32 %v3133_v50, %v3787_v60 }
 0x1d2   :  { %480 = vadd.xlane.f32.xlu1 %v459_v40  ;;  %v3137_v54 = vpop.eup %3136  ;;  %v468_v55 = vmul.f32 %v3135_v52, %v3787_v60 }
 0x1d3   :  { %486 = vadd.xlane.f32.xlu0 %v462_v36  ;;  %v467_v56 = vmul.f32 %v3137_v54, %v3787_v60  ;;  %v3139_v57 = vpop.eup %3138 }
 0x1d4   :  { %v469_v58 = vmul.f32 %v3139_v57, %v3787_v60 }
 0x1d6   :  { %488 = vadd.xlane.f32.xlu1 %v463_v45 }
 0x1d7   :  { %482 = vadd.xlane.f32.xlu0 %v460_v42 }
 0x1da   :  { %484 = vadd.xlane.f32.xlu1 %v461_v49 }
 0x1db   :  { %490 = vadd.xlane.f32.xlu0 %v464_v47 }
 0x1de   :  { %492 = vadd.xlane.f32.xlu1 %v465_v53 }
 0x1df   :  { %494 = vadd.xlane.f32.xlu0 %v466_v51 }
 0x1e2   :  { %496 = vadd.xlane.f32.xlu1 %v467_v56 }
 0x1e3   :  { %498 = vadd.xlane.f32.xlu0 %v468_v55 }
 0x1e6   :  { %500 = vadd.xlane.f32.xlu1 %v469_v58  ;;  %v520_v58 = vld [vmem:[%s3998_s5] sm:$0xff] }
 0x1e7   :  { %vm521_vm9 = vcmp.gt.f32.partialorder %v520_v58, 0.5  ;;  %v2906_v58 = vld [vmem:[#allocation14 + $0x18] sm:$0xff]  }
 0x254   :  { %v471_v59 = vpop.xlane.xlu0 %470 }
 0x255   :  { %v504_v13 = vadd.f32 %v503_v9, %v471_v59 }
 0x257   :  { %v475_v62 = vpop.xlane.xlu1 %474  ;;  %v543_v33 = vrot.slane %v504_v13, %v542_v21 }
 0x258   :  { %v473_v61 = vpop.xlane.xlu0 %472  ;;  %v506_v12 = vadd.f32 %v503_v9, %v475_v62 }
 0x259   :  { %v505_v16 = vadd.f32 %v503_v9, %v473_v61 }
 0x25a   :  { %v554_v27 = vrot.slane %v506_v12, %v542_v21  ;;  %v2892_v12 = vld [vmem:[#allocation9] sm:$0xff]  }
 0x25b   :  { %v477_v1 = vpop.xlane.xlu1 %476  ;;  %v548_v28 = vrot.slane %v505_v16, %v547_v14  ;;  %2775 = vmatpush3.bf16.msra.mxu1 %v2892_v12  ;;  %v2931_v12 = vld [vmem:[#allocation17 + $0x48] ss:$16 sps:$4 sm:$0xff]  }
 0x25c   :  { %v479_v63 = vpop.xlane.xlu0 %478  ;;  %v507_v10 = vadd.f32 %v503_v9, %v477_v1  ;;  %2780 = vmatprep.subr.bf16.mxu1 %v3493_v0 }
 0x25d   :  { %v508_v19 = vadd.f32 %v503_v9, %v479_v63  ;;  %v550_v42 = vsel %vm549_vm1, %v548_v28, %v543_v33  ;;  %v2896_v33 = vld [vmem:[#allocation9 + $0x38] sm:$0xff]  }
 0x25e   :  { %v558_v22 = vrot.slane %v507_v10, %v547_v14 }
 0x25f   :  { %v481_v3 = vpop.xlane.xlu1 %480  ;;  %v563_v31 = vrot.slane %v508_v19, %v542_v21 }
 0x260   :  { %v487_v2 = vpop.xlane.xlu0 %486  ;;  %v509_v60 = vadd.f32 %v503_v9, %v481_v3  ;;  %v559_v34 = vsel %vm549_vm1, %v558_v22, %v554_v27  ;;  %v2893_v27 = vld [vmem:[#allocation9 + $0x8] sm:$0xff]  }
 0x261   :  { %v512_v38 = vadd.f32 %v503_v9, %v487_v2  ;;  %v615_v46 = vsel %vm614_vm2, %v559_v34, %v550_v42 }
 0x262   :  { %v567_v24 = vrot.slane %v509_v60, %v547_v14 }
 0x263   :  { %v489_v6 = vpop.xlane.xlu1 %488  ;;  %v581_v52 = vrot.slane %v512_v38, %v542_v21 }
 0x264   :  { %v483_v4 = vpop.xlane.xlu0 %482  ;;  %v513_v32 = vadd.f32 %v503_v9, %v489_v6  ;;  %v568_v37 = vsel %vm549_vm1, %v567_v24, %v563_v31 }
 0x265   :  { %v510_v23 = vadd.f32 %v503_v9, %v483_v4  ;;  %v617_v48 = vsel %vm616_vm3, %v568_v37, %v615_v46 }
 0x266   :  { %v585_v47 = vrot.slane %v513_v32, %v547_v14 }
 0x267   :  { %v485_v11 = vpop.xlane.xlu1 %484  ;;  %v572_v35 = vrot.slane %v510_v23, %v542_v21 }
 0x268   :  { %v491_v8 = vpop.xlane.xlu0 %490  ;;  %v511_v18 = vadd.f32 %v503_v9, %v485_v11  ;;  %v586_v59 = vsel %vm549_vm1, %v585_v47, %v581_v52  ;;  %v2900_v52 = vld [vmem:[#allocation14] sm:$0xff]  }
 0x269   :  { %v514_v36 = vadd.f32 %v503_v9, %v491_v8 }
 0x26a   :  { %v576_v29 = vrot.slane %v511_v18, %v547_v14 }
 0x26b   :  { %v493_v26 = vpop.xlane.xlu1 %492  ;;  %v590_v49 = vrot.slane %v514_v36, %v542_v21  ;;  %v2895_v36 = vld [vmem:[#allocation9 + $0x10] sm:$0xff]  }
 0x26c   :  { %v495_v20 = vpop.xlane.xlu0 %494  ;;  %v515_v30 = vadd.f32 %v503_v9, %v493_v26  ;;  %v577_v43 = vsel %vm549_vm1, %v576_v29, %v572_v35 }
 0x26d   :  { %v516_v39 = vadd.f32 %v503_v9, %v495_v20  ;;  %v619_v53 = vsel %vm618_vm4, %v577_v43, %v617_v48  ;;  %v2899_v48 = vld [vmem:[#allocation9 + $0x30] sm:$0xff]  }
 0x26e   :  { %v594_v44 = vrot.slane %v515_v30, %v547_v14  ;;  %v621_v1 = vsel %vm620_vm5, %v586_v59, %v619_v53  ;;  %v2901_v53 = vld [vmem:[#allocation15] sm:$0xff]   ;;  %v2907_v59 = vld [vmem:[#allocation15 + $0x18] sm:$0xff]  }
 0x26f   :  { %v497_v40 = vpop.xlane.xlu1 %496  ;;  %v599_v54 = vrot.slane %v516_v39, %v542_v21 }
 0x270   :  { %v499_v41 = vpop.xlane.xlu0 %498  ;;  %v517_v45 = vadd.f32 %v503_v9, %v497_v40  ;;  %v595_v56 = vsel %vm549_vm1, %v594_v44, %v590_v49 }
 0x271   :  { %v518_v51 = vadd.f32 %v503_v9, %v499_v41  ;;  %v623_v2 = vsel %vm622_vm6, %v595_v56, %v621_v1  ;;  %v2897_v41 = vld [vmem:[#allocation9 + $0x18] sm:$0xff]   ;;  %v2904_v56 = vld [vmem:[#allocation14 + $0x10] sm:$0xff]   ;;  %v2911_v1 = vld [vmem:[#allocation15 + $0x28] sm:$0xff]  }
 0x272   :  { %v603_v50 = vrot.slane %v517_v45, %v547_v14  ;;  %v2898_v45 = vld [vmem:[#allocation9 + $0x20] sm:$0xff]  }
 0x273   :  { %v501_v55 = vpop.xlane.xlu1 %500  ;;  %v608_v62 = vrot.slane %v518_v51, %v542_v21 }
 0x274   :  { %v519_v57 = vadd.f32 %v503_v9, %v501_v55  ;;  %v604_v61 = vsel %vm549_vm1, %v603_v50, %v599_v54  ;;  %v2902_v54 = vld [vmem:[#allocation14 + $0x8] sm:$0xff]  }
 0x275   :  { %v625_v4 = vsel %vm624_vm7, %v604_v61, %v623_v2  ;;  %v2903_v55 = vld [vmem:[#allocation15 + $0x8] sm:$0xff]   ;;  %v2908_v61 = vld [vmem:[#allocation14 + $0x20] sm:$0xff]   ;;  %v2912_v2 = vld [vmem:[#allocation14 + $0x30] sm:$0xff]  }
 0x276   :  { %v612_v63 = vrot.slane %v519_v57, %v547_v14  ;;  %v2894_v14 = vld [vmem:[#allocation9 + $0x28] sm:$0xff]   ;;  %v2905_v57 = vld [vmem:[#allocation15 + $0x10] sm:$0xff]  }
 0x277   :  { %2805 = vmatpush3.bf16.msra.mxu0 %v2894_v14  ;;  %v2939_v14 = vld [vmem:[#allocation17 + $0x6c] ss:$16 sps:$4 sm:$0xff]  }
 0x278   :  { %v613_v3 = vsel %vm549_vm1, %v612_v63, %v608_v62  ;;  %2816 = vmatprep.subr.bf16.mxu0 %v3493_v0  ;;  %v2909_v62 = vld [vmem:[#allocation15 + $0x20] sm:$0xff]   ;;  %v2910_v63 = vld [vmem:[#allocation14 + $0x28] sm:$0xff]  }
 0x279   :  { %v627_v5 = vsel %vm626_vm8, %v613_v3, %v625_v4  ;;  %v2913_v3 = vld [vmem:[#allocation15 + $0x30] sm:$0xff]   ;;  %v2914_v4 = vld [vmem:[#allocation14 + $0x38] sm:$0xff]  }
 0x27a   :  { %v629_v6 = vsel %vm521_vm9, %v627_v5, -1e+09  ;;  %v2915_v5 = vld [vmem:[#allocation15 + $0x38] sm:$0xff]  }
 0x27b   :  { %v631_v7 = vsel %vm630_vm10, %v629_v6, -inf }
 0x27c   :  { %632 = vmax.xlane.f32.xlu0 %v631_v7  ;;  %v2918_v7 = vld [vmem:[#allocation17 + $0x4] ss:$16 sps:$4 sm:$0xff]  }
 0x309   :  { %v633_v8 = vpop.xlane.xlu0 %632 }
 0x30a   :  { %v634_v9 = vsub.f32 %v629_v6, %v633_v8  ;;  %v1125_v6 = vld [vmem:[#allocation3] sm:$0xf]  ;;  %v2919_v8 = vld [vmem:[#allocation17 + $0x8] ss:$16 sps:$4 sm:$0xff]  }
 0x30c   :  { %v635_v10 = vmul.f32 1.442695, %v634_v9  ;;  %v2921_v9 = vld [vmem:[#allocation17 + $0xc] ss:$16 sps:$4 sm:$0xff]  }
 0x30e   :  { %3140 = vpow2.f32 %v635_v10  ;;  %v2927_v10 = vld [vmem:[#allocation17 + $0x2c] ss:$16 sps:$4 sm:$0xff]  }
 0x318   :  { %v3141_v60 = vpop.eup %3140 }
 0x319   :  { %v637_v11 = vsel %vm630_vm10, %v3141_v60, 0.0 }
 0x31a   :  { %638 = vadd.xlane.f32.xlu1 %v637_v11  ;;  %v2933_v11 = vld [vmem:[#allocation17 + $0x4c] ss:$16 sps:$4 sm:$0xff]  }
 0x3a7   :  { %v639_v16 = vpop.xlane.xlu1 %638 }
 0x3a8   :  { %3142 = vrcp.f32 %v639_v16  ;;  %v2937_v16 = vld [vmem:[#allocation17 + $0x68] ss:$16 sps:$4 sm:$0xff]  }
 0x3b2   :  { %v3143_v18 = vpop.eup %3142 }
 0x3b3   :  { %v641_v19 = vmul.f32 %v3143_v18, %v3141_v60  ;;  %v2925_v60 = vld [vmem:[#allocation17 + $0x28] ss:$16 sps:$4 sm:$0xff]  }
 0x3b4   :  { %v2943_v18 = vld [vmem:[#allocation17 + $0x88] ss:$16 sps:$4 sm:$0xff]  }
 0x3b5   :  { %v643_v20 = vpack.c.bf16 %v641_v19, %v641_v19  ;;  %642 = vst.msk [vmem:[#allocation22] sm:$0xff] %vm630_vm10, %v641_v19  ;;  %v2951_v19 = vld [vmem:[#allocation17 + $0xac] ss:$16 sps:$4 sm:$0xff]  }
 0x3b7   :  { %v651_v21 = vrot.slane %v643_v20, %v3768_v17  ;;  %v2949_v20 = vld [vmem:[#allocation17 + $0xa8] ss:$16 sps:$4 sm:$0xff]  }
 0x3b9   :  { %v652_v13 = vcombine.high %v651_v21, %v651_v21  ;;  %v659_v22 = vrot.slane %v651_v21, %v3768_v17  ;;  %v2957_v21 = vld [vmem:[#allocation17 + $0xcc] ss:$16 sps:$4 sm:$0xff]  }
 0x3bb   :  { %v666_v23 = vrot.slane %v652_v13, %v3768_v17  ;;  %v2500_v24 = vpack.i.b16 %v659_v22, %v659_v22  ;;  %v667_v26 = vcombine.high %v659_v22, %v659_v22  ;;  %v670_v30 = vunpack.i.h.s16 %v659_v22  ;;  %v2955_v13 = vld [vmem:[#allocation17 + $0xc8] ss:$16 sps:$4 sm:$0xff]   ;;  %v2963_v22 = vld [vmem:[#allocation17 + $0xec] ss:$16 sps:$4 sm:$0xff]  }
 0x3bd   :  { %v697_v28 = vrot.slane %v2500_v24, %v3772_v25  ;;  %v674_v29 = vunpack.i.h.s16 %v667_v26  ;;  %v668_v31 = vcombine.high %v666_v23, %v666_v23  ;;  %v747_v17 = vpack.i.b16 %v670_v30, %v670_v30  ;;  %v2969_v24 = vld [vmem:[#allocation17 + $0x10c] ss:$16 sps:$4 sm:$0xff]   ;;  %v2979_v30 = vld [vmem:[#allocation17 + $0x148] ss:$16 sps:$4 sm:$0xff]  }
 0x3be   :  { %v2505_v40 = vpack.i.b16 %v666_v23, %v666_v23  ;;  %v672_v43 = vunpack.i.h.s16 %v666_v23  ;;  %v2510_v47 = vpack.i.b16 %v667_v26, %v667_v26  ;;  %v2961_v23 = vld [vmem:[#allocation17 + $0xe8] ss:$16 sps:$4 sm:$0xff]  }
 0x3bf   :  { %2777 = vmatmul.mubr.msk.bf16.vlgmr.msra.gmra.mrb[0].mxu1 %vm630_vm10, %v697_v28  ;;  %v963_v32 = vpack.i.b16 %v674_v29, %v674_v29  ;;  %v676_v35 = vunpack.i.h.s16 %v668_v31  ;;  %v751_v37 = vrot.slane %v747_v17, %v3772_v25  ;;  %v2515_v50 = vpack.i.b16 %v668_v31, %v668_v31  ;;  %v2967_v26 = vld [vmem:[#allocation17 + $0x108] ss:$16 sps:$4 sm:$0xff]   ;;  %v2981_v29 = vld [vmem:[#allocation17 + $0x14c] ss:$16 sps:$4 sm:$0xff]  }
 0x3c0   :  { %2781 = vmatpush3.bf16.msra.mxu1 %v2893_v27  ;;  %2782 = vmatprep.mubr.msk.bf16.mxu1 %vm3494_vm0, %v3493_v0  ;;  %v805_v42 = vrot.slane %v2505_v40, %v3772_v25  ;;  %v855_v44 = vpack.i.b16 %v672_v43, %v672_v43  ;;  %v913_v49 = vrot.slane %v2510_v47, %v3772_v25  ;;  %v2975_v27 = vld [vmem:[#allocation17 + $0x12c] ss:$16 sps:$4 sm:$0xff]   ;;  %v2973_v28 = vld [vmem:[#allocation17 + $0x128] ss:$16 sps:$4 sm:$0xff]  }
 0x3c1   :  { %v967_v34 = vrot.slane %v963_v32, %v3772_v25  ;;  %2786 = vmatprep.subr.bf16.mxu1 %v3493_v0  ;;  %v1071_v38 = vpack.i.b16 %v676_v35, %v676_v35  ;;  %v1021_v51 = vrot.slane %v2515_v50, %v3772_v25  ;;  %v2987_v31 = vld [vmem:[#allocation17 + $0x16c] ss:$16 sps:$4 sm:$0xff]   ;;  %v2985_v32 = vld [vmem:[#allocation17 + $0x168] ss:$16 sps:$4 sm:$0xff]  }
 0x3c2   :  { %v859_v46 = vrot.slane %v855_v44, %v3772_v25  ;;  %v2997_v43 = vld [vmem:[#allocation17 + $0x1a8] ss:$16 sps:$4 sm:$0xff]   ;;  %v2999_v44 = vld [vmem:[#allocation17 + $0x1ac] ss:$16 sps:$4 sm:$0xff]  }
 0x3c3   :  { %2807 = vmatmul.mubr.msk.bf16.vlgmr.msra.gmra.mrb[4].mxu0 %vm630_vm10, %v967_v34  ;;  %v1075_v39 = vrot.slane %v1071_v38, %v3772_v25  ;;  %v2991_v34 = vld [vmem:[#allocation17 + $0x188] ss:$16 sps:$4 sm:$0xff]  }
 0x3c4   :  { %2817 = vmatpush3.bf16.msra.mxu0 %v2896_v33  ;;  %2818 = vmatprep.mubr.msk.bf16.mxu0 %vm3494_vm0, %v3493_v0  ;;  %v2993_v33 = vld [vmem:[#allocation17 + $0x18c] ss:$16 sps:$4 sm:$0xff]  }
 0x3c5   :  { %2842 = vmatprep.subr.bf16.mxu0 %v3493_v0 }
 0x3c7   :  { %2783 = vmatmul.mubr.msk.bf16.vlgmr.msra.gmra.mrb[4].mxu1 %vm630_vm10, %v751_v37 }
 0x3c8   :  { %2787 = vmatpush3.bf16.msra.mxu1 %v2895_v36  ;;  %2788 = vmatprep.mubr.msk.bf16.mxu1 %vm3494_vm0, %v3493_v0 }
 0x3c9   :  { %2792 = vmatprep.subr.bf16.mxu1 %v3493_v0 }
 0x3cb   :  { %2819 = vmatmul.mubr.msk.bf16.vlgmr.msra.gmra.mrb[8].mxu0 %vm630_vm10, %v1075_v39 }
 0x3cc   :  { %2858 = vmatprep.mubr.msk.bf16.mxu0 %vm3494_vm0, %v3493_v0  ;;  %2843 = vmatpush3.bf16.msra.mxu0 %v2900_v52 }
 0x3cd   :  { %2844 = vmatprep.subr.bf16.mxu0 %v3493_v0 }
 0x3cf   :  { %2789 = vmatmul.mubr.msk.bf16.vlgmr.msra.gmra.mrb[8].mxu1 %vm630_vm10, %v805_v42 }
 0x3d0   :  { %2793 = vmatpush3.bf16.msra.mxu1 %v2897_v41  ;;  %2794 = vmatprep.mubr.msk.bf16.mxu1 %vm3494_vm0, %v3493_v0 }
 0x3d1   :  { %2798 = vmatprep.subr.bf16.mxu1 %v3493_v0  ;;  %2845 = vmatpush3.bf16.msra.mxu0 %v2902_v54 }
 0x3d2   :  { %2846 = vmatprep.subr.bf16.mxu0 %v3493_v0 }
 0x3d5   :  { %2847 = vmatpush3.bf16.msra.mxu0 %v2904_v56 }
 0x3d6   :  { %2848 = vmatprep.subr.bf16.mxu0 %v3493_v0 }
 0x3d7   :  { %2795 = vmatmul.mubr.msk.bf16.vlgmr.msra.gmra.mrb[12].mxu1 %vm630_vm10, %v859_v46 }
 0x3d8   :  { %2799 = vmatpush3.bf16.msra.mxu1 %v2898_v45  ;;  %2800 = vmatprep.mubr.msk.bf16.mxu1 %vm3494_vm0, %v3493_v0 }
 0x3d9   :  { %2810 = vmatprep.subr.bf16.mxu1 %v3493_v0  ;;  %2849 = vmatpush3.bf16.msra.mxu0 %v2906_v58 }
 0x3da   :  { %2850 = vmatprep.subr.bf16.mxu0 %v3493_v0 }
 0x3dd   :  { %2851 = vmatpush3.bf16.msra.mxu0 %v2908_v61 }
 0x3de   :  { %2852 = vmatprep.subr.bf16.mxu0 %v3493_v0 }
 0x3df   :  { %2801 = vmatmul.mubr.msk.bf16.vlgmr.msra.gmra.mrb[16].mxu1 %vm630_vm10, %v913_v49 }
 0x3e0   :  { %2811 = vmatpush3.bf16.msra.mxu1 %v2899_v48  ;;  %2812 = vmatprep.mubr.msk.bf16.mxu1 %vm3494_vm0, %v3493_v0 }
 0x3e1   :  { %2822 = vmatprep.subr.bf16.mxu1 %v3493_v0  ;;  %2853 = vmatpush3.bf16.msra.mxu0 %v2910_v63 }
 0x3e2   :  { %2854 = vmatprep.subr.bf16.mxu0 %v3493_v0 }
 0x3e5   :  { %2855 = vmatpush3.bf16.msra.mxu0 %v2912_v2 }
 0x3e6   :  { %2856 = vmatprep.subr.bf16.mxu0 %v3493_v0 }
 0x3e7   :  { %2813 = vmatmul.mubr.msk.bf16.vlgmr.msra.gmra.mrb[20].mxu1 %vm630_vm10, %v1021_v51 }
 0x3e8   :  { %2838 = vmatprep.mubr.msk.bf16.mxu1 %vm3494_vm0, %v3493_v0  ;;  %2823 = vmatpush3.bf16.msra.mxu1 %v2901_v53 }
 0x3e9   :  { %2824 = vmatprep.subr.bf16.mxu1 %v3493_v0  ;;  %2857 = vmatpush3.bf16.msra.mxu0 %v2914_v4 }
 0x3ea   :  { %1834 = vmatprep.subr.bf16.mxu0 %v2921_v9 }
 0x3ec   :  { %2825 = vmatpush3.bf16.msra.mxu1 %v2903_v55  ;;  %2859 = vmatmul.mubr.bf16.vlgmr.msra.gmra.mrb[12].mxu0 %v1125_v6 }
 0x3ed   :  { %2826 = vmatprep.subr.bf16.mxu1 %v3493_v0  ;;  %1835 = vmatpush1.bf16.msra.mxu0 %v2919_v8 }
 0x3ee   :  { %1836 = vmatprep.subr.bf16.mxu0 %v2927_v10 }
 0x3f0   :  { %2827 = vmatpush3.bf16.msra.mxu1 %v2905_v57 }
 0x3f1   :  { %2828 = vmatprep.subr.bf16.mxu1 %v3493_v0  ;;  %1837 = vmatpush1.bf16.msra.mxu0 %v2925_v60 }
 0x3f2   :  { %1838 = vmatprep.subr.bf16.mxu0 %v2933_v11 }
 0x3f4   :  { %2829 = vmatpush3.bf16.msra.mxu1 %v2907_v59 }
 0x3f5   :  { %2830 = vmatprep.subr.bf16.mxu1 %v3493_v0  ;;  %1839 = vmatpush1.bf16.msra.mxu0 %v2931_v12 }
 0x3f6   :  { %1840 = vmatprep.subr.bf16.mxu0 %v2939_v14 }
 0x3f8   :  { %2831 = vmatpush3.bf16.msra.mxu1 %v2909_v62 }
 0x3f9   :  { %2832 = vmatprep.subr.bf16.mxu1 %v3493_v0  ;;  %1841 = vmatpush1.bf16.msra.mxu0 %v2937_v16 }
 0x3fc   :  { %2833 = vmatpush3.bf16.msra.mxu1 %v2911_v1 }
 0x3fd   :  { %2834 = vmatprep.subr.bf16.mxu1 %v3493_v0 }
 0x400   :  { %2835 = vmatpush3.bf16.msra.mxu1 %v2913_v3 }
 0x401   :  { %2836 = vmatprep.subr.bf16.mxu1 %v3493_v0  ;;  %v2945_v0 = vld [vmem:[#allocation17 + $0x8c] ss:$16 sps:$4 sm:$0xff]  }
 0x402   :  { %1842 = vmatprep.subr.bf16.mxu0 %v2945_v0 }
 0x403   :  { %1843 = vmatpush1.bf16.msra.mxu0 %v2943_v18 }
 0x404   :  { %2837 = vmatpush3.bf16.msra.mxu1 %v2915_v5  ;;  %1844 = vmatprep.subr.bf16.mxu0 %v2951_v19 }
 0x405   :  { %1793 = vmatprep.subr.bf16.mxu1 %v2918_v7 }
 0x407   :  { %1845 = vmatpush1.bf16.msra.mxu0 %v2949_v20 }
 0x408   :  { %1846 = vmatprep.subr.bf16.mxu0 %v2957_v21 }
 0x40b   :  { %1847 = vmatpush1.bf16.msra.mxu0 %v2955_v13 }
 0x40c   :  { %1848 = vmatprep.subr.bf16.mxu0 %v2963_v22 }
 0x40f   :  { %1849 = vmatpush1.bf16.msra.mxu0 %v2961_v23 }
 0x410   :  { %1850 = vmatprep.subr.bf16.mxu0 %v2969_v24 }
 0x413   :  { %1851 = vmatpush1.bf16.msra.mxu0 %v2967_v26 }
 0x414   :  { %1852 = vmatprep.subr.bf16.mxu0 %v2975_v27 }
 0x417   :  { %1853 = vmatpush1.bf16.msra.mxu0 %v2973_v28 }
 0x418   :  { %1854 = vmatprep.subr.bf16.mxu0 %v2981_v29 }
 0x41b   :  { %1855 = vmatpush1.bf16.msra.mxu0 %v2979_v30 }
 0x41c   :  { %1856 = vmatprep.subr.bf16.mxu0 %v2987_v31 }
 0x41f   :  { %1857 = vmatpush1.bf16.msra.mxu0 %v2985_v32 }
 0x420   :  { %1858 = vmatprep.subr.bf16.mxu0 %v2993_v33 }
 0x423   :  { %1859 = vmatpush1.bf16.msra.mxu0 %v2991_v34 }
 0x424   :  { %1860 = vmatprep.subr.bf16.mxu0 %v2999_v44  ;;  %v2942_v44 = vld [vmem:[#allocation17 + $0x84] ss:$16 sps:$4 sm:$0xff]  }
 0x427   :  { %1861 = vmatpush1.bf16.msra.mxu0 %v2997_v43  ;;  %v2934_v43 = vld [vmem:[#allocation17 + $0x60] ss:$16 sps:$4 sm:$0xff]  }
 0x492   :  { %v741_v17 = vpop.f32.mrb[0].mxu1 }
 0x493   :  { %v2778_v35 = vpop.f32.mrb[1].mxu1  ;;  %v1142_v45 = vpack.c.bf16 %v741_v17, %v741_v17 }
 0x494   :  { %v744_v36 = vpop.f32.mrb[2].mxu1 }
 0x495   :  { %v2779_v37 = vpop.f32.mrb[3].mxu1  ;;  %v1174_v52 = vunpack.c.l.b16 %v1142_v45  ;;  %v2916_v36 = vld [vmem:[#allocation17] ss:$16 sps:$4 sm:$0xff]  }
 0x496   :  { %v1011_v38 = vpop.f32.mrb[4].mxu0  ;;  %v2940_v45 = vld [vmem:[#allocation17 + $0x80] ss:$16 sps:$4 sm:$0xff]  }
 0x497   :  { %v2808_v39 = vpop.f32.mrb[5].mxu0  ;;  %v1147_v60 = vpack.c.bf16 %v1011_v38, %v1011_v38  ;;  %v2924_v38 = vld [vmem:[#allocation17 + $0x24] ss:$16 sps:$4 sm:$0xff]  }
 0x498   :  { %v1014_v40 = vpop.f32.mrb[6].mxu0  ;;  %v2922_v39 = vld [vmem:[#allocation17 + $0x20] ss:$16 sps:$4 sm:$0xff]  }
 0x499   :  { %v2809_v41 = vpop.f32.mrb[7].mxu0  ;;  %v1179_v0 = vunpack.c.l.b16 %v1147_v60  ;;  %v2930_v40 = vld [vmem:[#allocation17 + $0x44] ss:$16 sps:$4 sm:$0xff]  }
 0x49a   :  { %v795_v42 = vpop.f32.mrb[4].mxu1  ;;  %v2928_v41 = vld [vmem:[#allocation17 + $0x40] ss:$16 sps:$4 sm:$0xff]   ;;  %v3008_v60 = vld [vmem:[#allocation17 + $0x1e4] ss:$16 sps:$4 sm:$0xff]  }
 0x49b   :  { %v1143_v46 = vpack.c.bf16 %v795_v42, %v795_v42  ;;  %v2784_v47 = vpop.f32.mrb[5].mxu1  ;;  %v1190_v13 = vrot.slane %v1179_v0, 3  ;;  %v2936_v42 = vld [vmem:[#allocation17 + $0x64] ss:$16 sps:$4 sm:$0xff]  }
 0x49c   :  { %v798_v48 = vpop.f32.mrb[6].mxu1  ;;  %v2946_v47 = vld [vmem:[#allocation17 + $0xa0] ss:$16 sps:$4 sm:$0xff]   ;;  %v3014_v0 = vld [vmem:[#allocation17 + $0x204] ss:$16 sps:$4 sm:$0xff]  }
 0x49d   :  { %v1175_v49 = vunpack.c.l.b16 %v1143_v46  ;;  %v2785_v50 = vpop.f32.mrb[7].mxu1  ;;  %v2948_v46 = vld [vmem:[#allocation17 + $0xa4] ss:$16 sps:$4 sm:$0xff]  }
 0x49e   :  { %v1119_v51 = vpop.f32.mrb[8].mxu0  ;;  %v2954_v48 = vld [vmem:[#allocation17 + $0xc4] ss:$16 sps:$4 sm:$0xff]  }
 0x49f   :  { %v1182_v53 = vrot.slane %v1175_v49, 7  ;;  %v2820_v54 = vpop.f32.mrb[9].mxu0  ;;  %v1149_v22 = vpack.c.bf16 %v1119_v51, %v1119_v51  ;;  %v2952_v49 = vld [vmem:[#allocation17 + $0xc0] ss:$16 sps:$4 sm:$0xff]   ;;  %v2960_v50 = vld [vmem:[#allocation17 + $0xe4] ss:$16 sps:$4 sm:$0xff]  }
 0x4a0   :  { %v1122_v55 = vpop.f32.mrb[10].mxu0  ;;  %v2958_v51 = vld [vmem:[#allocation17 + $0xe0] ss:$16 sps:$4 sm:$0xff]   ;;  %v2972_v54 = vld [vmem:[#allocation17 + $0x124] ss:$16 sps:$4 sm:$0xff]  }
 0x4a1   :  { %v1183_v56 = vsel %vm614_vm2, %v1182_v53, %v1174_v52  ;;  %v2821_v57 = vpop.f32.mrb[11].mxu0  ;;  %v1181_v29 = vunpack.c.l.b16 %v1149_v22  ;;  %v2966_v52 = vld [vmem:[#allocation17 + $0x104] ss:$16 sps:$4 sm:$0xff]   ;;  %v2964_v53 = vld [vmem:[#allocation17 + $0x100] ss:$16 sps:$4 sm:$0xff]  }
 0x4a2   :  { %v849_v58 = vpop.f32.mrb[8].mxu1  ;;  %v2970_v55 = vld [vmem:[#allocation17 + $0x120] ss:$16 sps:$4 sm:$0xff]  }
 0x4a3   :  { %v1144_v59 = vpack.c.bf16 %v849_v58, %v849_v58  ;;  %v2790_v61 = vpop.f32.mrb[9].mxu1  ;;  %v1194_v34 = vrot.slane %v1181_v29, 1  ;;  %v2976_v57 = vld [vmem:[#allocation17 + $0x140] ss:$16 sps:$4 sm:$0xff]   ;;  %v2984_v58 = vld [vmem:[#allocation17 + $0x164] ss:$16 sps:$4 sm:$0xff]  }
 0x4a4   :  { %v852_v62 = vpop.f32.mrb[10].mxu1  ;;  %v2990_v61 = vld [vmem:[#allocation17 + $0x184] ss:$16 sps:$4 sm:$0xff]  }
 0x4a5   :  { %v1176_v63 = vunpack.c.l.b16 %v1144_v59  ;;  %v2791_v1 = vpop.f32.mrb[11].mxu1  ;;  %v2982_v59 = vld [vmem:[#allocation17 + $0x160] ss:$16 sps:$4 sm:$0xff]  }
 0x4a6   :  { %v2988_v62 = vld [vmem:[#allocation17 + $0x180] ss:$16 sps:$4 sm:$0xff]  }
 0x4a7   :  { %v1184_v2 = vrot.slane %v1176_v63, 6  ;;  %v2996_v63 = vld [vmem:[#allocation17 + $0x1a4] ss:$16 sps:$4 sm:$0xff]   ;;  %v2994_v1 = vld [vmem:[#allocation17 + $0x1a0] ss:$16 sps:$4 sm:$0xff]  }
 0x4a9   :  { %v1185_v3 = vsel %vm616_vm3, %v1184_v2, %v1183_v56  ;;  %v2978_v56 = vld [vmem:[#allocation17 + $0x144] ss:$16 sps:$4 sm:$0xff]  }
 0x4aa   :  { %v903_v4 = vpop.f32.mrb[12].mxu1 }
 0x4ab   :  { %v1145_v5 = vpack.c.bf16 %v903_v4, %v903_v4  ;;  %v2796_v6 = vpop.f32.mrb[13].mxu1 }
 0x4ac   :  { %v906_v7 = vpop.f32.mrb[14].mxu1  ;;  %v3005_v6 = vld [vmem:[#allocation17 + $0x1cc] ss:$16 sps:$4 sm:$0xff]  }
 0x4ad   :  { %v1177_v8 = vunpack.c.l.b16 %v1145_v5  ;;  %v2797_v9 = vpop.f32.mrb[15].mxu1  ;;  %v3002_v5 = vld [vmem:[#allocation17 + $0x1c4] ss:$16 sps:$4 sm:$0xff]   ;;  %1862 = vmatprep.subr.bf16.mxu0 %v3005_v6  ;;  %v3075_v6 = vld [vmem:[#allocation17 + $0x348] ss:$16 sps:$4 sm:$0xff]  }
 0x4ae   :  { %v3003_v9 = vld [vmem:[#allocation17 + $0x1c8] ss:$16 sps:$4 sm:$0xff]  }
 0x4af   :  { %v1186_v10 = vrot.slane %v1177_v8, 5  ;;  %v3000_v8 = vld [vmem:[#allocation17 + $0x1c0] ss:$16 sps:$4 sm:$0xff]   ;;  %1863 = vmatpush1.bf16.msra.mxu0 %v3003_v9 }
 0x4b0   :  { %v3078_v9 = vld [vmem:[#allocation17 + $0x360] ss:$16 sps:$4 sm:$0xff]  }
 0x4b1   :  { %v1187_v11 = vsel %vm618_vm4, %v1186_v10, %v1185_v3  ;;  %v3006_v10 = vld [vmem:[#allocation17 + $0x1e0] ss:$16 sps:$4 sm:$0xff]  }
 0x4b2   :  { %v957_v12 = vpop.f32.mrb[16].mxu1 }
 0x4b3   :  { %v1146_v14 = vpack.c.bf16 %v957_v12, %v957_v12  ;;  %v2802_v16 = vpop.f32.mrb[17].mxu1  ;;  %v3011_v12 = vld [vmem:[#allocation17 + $0x1ec] ss:$16 sps:$4 sm:$0xff]  }
 0x4b4   :  { %v960_v18 = vpop.f32.mrb[18].mxu1  ;;  %1864 = vmatprep.subr.bf16.mxu0 %v3011_v12  ;;  %v3087_v12 = vld [vmem:[#allocation17 + $0x388] ss:$16 sps:$4 sm:$0xff]  }
 0x4b5   :  { %v1178_v19 = vunpack.c.l.b16 %v1146_v14  ;;  %v2803_v20 = vpop.f32.mrb[19].mxu1  ;;  %v1383_v14 = vld [vmem:[#allocation6] sm:$0xff]  ;;  %v3017_v18 = vld [vmem:[#allocation17 + $0x20c] ss:$16 sps:$4 sm:$0xff]  }
 0x4b6   :  { %v1386_v16 = vpack.c.bf16 %v1383_v14, %v1383_v14  ;;  %v2536_v20 = vld [vmem:[%s4005_s12] ss:$0 sm:$0xff] }
 0x4b7   :  { %v1188_v21 = vrot.slane %v1178_v19, 4  ;;  %v3089_v14 = vld [vmem:[#allocation17 + $0x38c] ss:$16 sps:$4 sm:$0xff]  }
 0x4b8   :  { %1866 = vmatprep.mubr.bf16.mxu0 %v1386_v16 }
 0x4b9   :  { %v1189_v23 = vsel %vm620_vm5, %v1188_v21, %v1187_v11  ;;  %v3009_v11 = vld [vmem:[#allocation17 + $0x1e8] ss:$16 sps:$4 sm:$0xff]  }
 0x4ba   :  { %v1065_v24 = vpop.f32.mrb[20].mxu1  ;;  %v1191_v26 = vsel %vm622_vm6, %v1190_v13, %v1189_v23  ;;  %1865 = vmatpush1.bf16.msra.mxu0 %v3009_v11  ;;  %v3086_v11 = vld [vmem:[#allocation17 + $0x384] ss:$16 sps:$4 sm:$0xff]  }
 0x4bb   :  { %v1148_v27 = vpack.c.bf16 %v1065_v24, %v1065_v24  ;;  %v2814_v28 = vpop.f32.mrb[21].mxu1  ;;  %2355 = vmatprep.subr.bf16.mxu0 %v3017_v18  ;;  %v3090_v18 = vld [vmem:[#allocation17 + $0x3a0] ss:$16 sps:$4 sm:$0xff]  }
 0x4bc   :  { %v1068_v30 = vpop.f32.mrb[22].mxu1  ;;  %v3015_v28 = vld [vmem:[#allocation17 + $0x208] ss:$16 sps:$4 sm:$0xff]  }
 0x4bd   :  { %v1180_v31 = vunpack.c.l.b16 %v1148_v27  ;;  %v2815_v32 = vpop.f32.mrb[23].mxu1  ;;  %v3012_v27 = vld [vmem:[#allocation17 + $0x200] ss:$16 sps:$4 sm:$0xff]   ;;  %v3020_v30 = vld [vmem:[#allocation17 + $0x224] ss:$16 sps:$4 sm:$0xff]  }
 0x4be   :  { %v3018_v32 = vld [vmem:[#allocation17 + $0x220] ss:$16 sps:$4 sm:$0xff]  }
 0x4bf   :  { %v1192_v33 = vrot.slane %v1180_v31, 2  ;;  %v1368_v2 = vpop.f32.mrb[12].mxu0  ;;  %v3023_v31 = vld [vmem:[#allocation17 + $0x22c] ss:$16 sps:$4 sm:$0xff]  }
 0x4c0   :  { %v2860_v3 = vpop.f32.mrb[13].mxu0 }
 0x4c1   :  { %v1193_v17 = vsel %vm624_vm7, %v1192_v33, %v1191_v26  ;;  %v1371_v4 = vpop.f32.mrb[14].mxu0  ;;  %v3021_v33 = vld [vmem:[#allocation17 + $0x228] ss:$16 sps:$4 sm:$0xff]   ;;  %v3074_v3 = vld [vmem:[#allocation17 + $0x344] ss:$16 sps:$4 sm:$0xff]  }
 0x4c2   :  { %v1195_v35 = vsel %vm626_vm8, %v1194_v34, %v1193_v17  ;;  %v2861_v7 = vpop.f32.mrb[15].mxu0  ;;  %v3026_v34 = vld [vmem:[#allocation17 + $0x244] ss:$16 sps:$4 sm:$0xff]   ;;  %v3029_v17 = vld [vmem:[#allocation17 + $0x24c] ss:$16 sps:$4 sm:$0xff]  }
 0x4c3   :  { %v1196_v37 = vpack.c.b16 %v1195_v35, %v1195_v35  ;;  %v3024_v35 = vld [vmem:[#allocation17 + $0x240] ss:$16 sps:$4 sm:$0xff]   ;;  %v3077_v4 = vld [vmem:[#allocation17 + $0x34c] ss:$16 sps:$4 sm:$0xff]   ;;  %v3080_v7 = vld [vmem:[#allocation17 + $0x364] ss:$16 sps:$4 sm:$0xff]  }
 0x4c5   :  { %2839 = vmatmul.mubr.bf16.vlgmr.msra.gmra.mrb[24].mxu1 %v1196_v37  ;;  %v3032_v37 = vld [vmem:[#allocation17 + $0x264] ss:$16 sps:$4 sm:$0xff]  }
 0x4c6   :  { %1794 = vmatpush1.bf16.msra.mxu1 %v2916_v36  ;;  %1825 = vmatprep.mubr.bf16.mxu1 %v1386_v16  ;;  %v3027_v36 = vld [vmem:[#allocation17 + $0x248] ss:$16 sps:$4 sm:$0xff]   ;;  %v3092_v16 = vld [vmem:[#allocation17 + $0x3a4] ss:$16 sps:$4 sm:$0xff]  }
 0x4c7   :  { %1795 = vmatprep.subr.bf16.mxu1 %v2924_v38  ;;  %v3035_v38 = vld [vmem:[#allocation17 + $0x26c] ss:$16 sps:$4 sm:$0xff]  }
 0x4ca   :  { %1796 = vmatpush1.bf16.msra.mxu1 %v2922_v39  ;;  %v3030_v39 = vld [vmem:[#allocation17 + $0x260] ss:$16 sps:$4 sm:$0xff]  }
 0x4cb   :  { %1797 = vmatprep.subr.bf16.mxu1 %v2930_v40  ;;  %v3033_v40 = vld [vmem:[#allocation17 + $0x268] ss:$16 sps:$4 sm:$0xff]  }
 0x4ce   :  { %1798 = vmatpush1.bf16.msra.mxu1 %v2928_v41  ;;  %v3038_v41 = vld [vmem:[#allocation17 + $0x284] ss:$16 sps:$4 sm:$0xff]  }
 0x4cf   :  { %1799 = vmatprep.subr.bf16.mxu1 %v2936_v42  ;;  %v3041_v42 = vld [vmem:[#allocation17 + $0x28c] ss:$16 sps:$4 sm:$0xff]  }
 0x4d2   :  { %1800 = vmatpush1.bf16.msra.mxu1 %v2934_v43  ;;  %v3036_v43 = vld [vmem:[#allocation17 + $0x280] ss:$16 sps:$4 sm:$0xff]  }
 0x4d3   :  { %1801 = vmatprep.subr.bf16.mxu1 %v2942_v44  ;;  %v3039_v44 = vld [vmem:[#allocation17 + $0x288] ss:$16 sps:$4 sm:$0xff]  }
 0x4d6   :  { %1802 = vmatpush1.bf16.msra.mxu1 %v2940_v45  ;;  %v3044_v45 = vld [vmem:[#allocation17 + $0x2a4] ss:$16 sps:$4 sm:$0xff]  }
 0x4d7   :  { %1803 = vmatprep.subr.bf16.mxu1 %v2948_v46  ;;  %v3047_v46 = vld [vmem:[#allocation17 + $0x2ac] ss:$16 sps:$4 sm:$0xff]  }
 0x4da   :  { %1804 = vmatpush1.bf16.msra.mxu1 %v2946_v47  ;;  %v3042_v47 = vld [vmem:[#allocation17 + $0x2a0] ss:$16 sps:$4 sm:$0xff]  }
 0x4db   :  { %1805 = vmatprep.subr.bf16.mxu1 %v2954_v48  ;;  %v3045_v48 = vld [vmem:[#allocation17 + $0x2a8] ss:$16 sps:$4 sm:$0xff]  }
 0x4de   :  { %1806 = vmatpush1.bf16.msra.mxu1 %v2952_v49  ;;  %v3050_v49 = vld [vmem:[#allocation17 + $0x2c4] ss:$16 sps:$4 sm:$0xff]  }
 0x4df   :  { %1807 = vmatprep.subr.bf16.mxu1 %v2960_v50  ;;  %v3053_v50 = vld [vmem:[#allocation17 + $0x2cc] ss:$16 sps:$4 sm:$0xff]  }
 0x4e2   :  { %1808 = vmatpush1.bf16.msra.mxu1 %v2958_v51  ;;  %v3048_v51 = vld [vmem:[#allocation17 + $0x2c0] ss:$16 sps:$4 sm:$0xff]  }
 0x4e3   :  { %1809 = vmatprep.subr.bf16.mxu1 %v2966_v52  ;;  %v3051_v52 = vld [vmem:[#allocation17 + $0x2c8] ss:$16 sps:$4 sm:$0xff]  }
 0x4e6   :  { %1810 = vmatpush1.bf16.msra.mxu1 %v2964_v53  ;;  %v3056_v53 = vld [vmem:[#allocation17 + $0x2e4] ss:$16 sps:$4 sm:$0xff]  }
 0x4e7   :  { %1811 = vmatprep.subr.bf16.mxu1 %v2972_v54  ;;  %v3059_v54 = vld [vmem:[#allocation17 + $0x2ec] ss:$16 sps:$4 sm:$0xff]  }
 0x4ea   :  { %1812 = vmatpush1.bf16.msra.mxu1 %v2970_v55  ;;  %v3054_v55 = vld [vmem:[#allocation17 + $0x2e0] ss:$16 sps:$4 sm:$0xff]  }
 0x4eb   :  { %1813 = vmatprep.subr.bf16.mxu1 %v2978_v56  ;;  %v3057_v56 = vld [vmem:[#allocation17 + $0x2e8] ss:$16 sps:$4 sm:$0xff]  }
 0x4ee   :  { %1814 = vmatpush1.bf16.msra.mxu1 %v2976_v57  ;;  %v3062_v57 = vld [vmem:[#allocation17 + $0x304] ss:$16 sps:$4 sm:$0xff]  }
 0x4ef   :  { %1815 = vmatprep.subr.bf16.mxu1 %v2984_v58  ;;  %v3065_v58 = vld [vmem:[#allocation17 + $0x30c] ss:$16 sps:$4 sm:$0xff]  }
 0x4f2   :  { %1816 = vmatpush1.bf16.msra.mxu1 %v2982_v59  ;;  %v3060_v59 = vld [vmem:[#allocation17 + $0x300] ss:$16 sps:$4 sm:$0xff]  }
 0x4f3   :  { %1817 = vmatprep.subr.bf16.mxu1 %v2990_v61  ;;  %v3063_v61 = vld [vmem:[#allocation17 + $0x308] ss:$16 sps:$4 sm:$0xff]  }
 0x4f6   :  { %1818 = vmatpush1.bf16.msra.mxu1 %v2988_v62  ;;  %v3068_v62 = vld [vmem:[#allocation17 + $0x324] ss:$16 sps:$4 sm:$0xff]  }
 0x4f7   :  { %1819 = vmatprep.subr.bf16.mxu1 %v2996_v63  ;;  %v3071_v63 = vld [vmem:[#allocation17 + $0x32c] ss:$16 sps:$4 sm:$0xff]  }
 0x4fa   :  { %1820 = vmatpush1.bf16.msra.mxu1 %v2994_v1  ;;  %v3066_v1 = vld [vmem:[#allocation17 + $0x320] ss:$16 sps:$4 sm:$0xff]  }
 0x4fb   :  { %1821 = vmatprep.subr.bf16.mxu1 %v3002_v5  ;;  %v3072_v5 = vld [vmem:[#allocation17 + $0x340] ss:$16 sps:$4 sm:$0xff]  }
 0x4fe   :  { %1822 = vmatpush1.bf16.msra.mxu1 %v3000_v8  ;;  %v3083_v8 = vld [vmem:[#allocation17 + $0x36c] ss:$16 sps:$4 sm:$0xff]  }
 0x4ff   :  { %1823 = vmatprep.subr.bf16.mxu1 %v3008_v60  ;;  %v3084_v60 = vld [vmem:[#allocation17 + $0x380] ss:$16 sps:$4 sm:$0xff]  }
 0x502   :  { %1824 = vmatpush1.bf16.msra.mxu1 %v3006_v10  ;;  %v3081_v10 = vld [vmem:[#allocation17 + $0x368] ss:$16 sps:$4 sm:$0xff]  }
 0x503   :  { %2314 = vmatprep.subr.bf16.mxu1 %v3014_v0  ;;  %v3095_v0 = vld [vmem:[#allocation17 + $0x3ac] ss:$16 sps:$4 sm:$0xff]  }
 0x598   :  { %v1280_v19 = vpop.f32.mrb[24].mxu1 }
 0x599   :  { %v1369_v21 = vadd.f32 %v1368_v2, %v1280_v19  ;;  %v2840_v13 = vpop.f32.mrb[25].mxu1  ;;  %v3069_v2 = vld [vmem:[#allocation17 + $0x328] ss:$16 sps:$4 sm:$0xff]  }
 0x59a   :  { %v1283_v22 = vpop.f32.mrb[26].mxu1  ;;  %v3093_v19 = vld [vmem:[#allocation17 + $0x3a8] ss:$16 sps:$4 sm:$0xff]  }
 0x59b   :  { %v1381_v23 = vadd.f32 %v2536_v20, %v1369_v21  ;;  %v2841_v24 = vpop.f32.mrb[27].mxu1  ;;  %v3098_v20 = vld [vmem:[#allocation17 + $0x3c4] ss:$16 sps:$4 sm:$0xff]   ;;  %v3101_v21 = vld [vmem:[#allocation17 + $0x3cc] ss:$16 sps:$4 sm:$0xff]  }
 0x59c   :  { %v1901_v13 = vld [vmem:[#allocation6 + $0x8] sm:$0xff] }
 0x59d   :  { %v1382_v26 = vmax.f32 %v1381_v23, 0.0  ;;  %v1905_v22 = vpack.c.bf16 %v1901_v13, %v1901_v13  ;;  %v3096_v23 = vld [vmem:[#allocation17 + $0x3c0] ss:$16 sps:$4 sm:$0xff]   ;;  %v3099_v24 = vld [vmem:[#allocation17 + $0x3c8] ss:$16 sps:$4 sm:$0xff]  }
 0x59f   :  { %v1385_v29 = vpack.c.bf16 %v1382_v26, %v1382_v26  ;;  %v3104_v26 = vld [vmem:[#allocation17 + $0x3e4] ss:$16 sps:$4 sm:$0xff]  }
 0x5a1   :  { %1826 = vmatmul.mubr.bf16.vlgmr.msra.gmra.mrb[28].mxu1 %v1385_v29  ;;  %1867 = vmatmul.mubr.bf16.vlgmr.msra.gmra.mrb[16].mxu0 %v1385_v29  ;;  %v3105_v29 = vld [vmem:[#allocation17 + $0x3e8] ss:$16 sps:$4 sm:$0xff]  }
 0x5a2   :  { %2315 = vmatpush1.bf16.msra.mxu1 %v3012_v27  ;;  %2356 = vmatpush1.bf16.msra.mxu0 %v3015_v28  ;;  %v3107_v27 = vld [vmem:[#allocation17 + $0x3ec] ss:$16 sps:$4 sm:$0xff]   ;;  %v3102_v28 = vld [vmem:[#allocation17 + $0x3e0] ss:$16 sps:$4 sm:$0xff]  }
 0x5a3   :  { %2316 = vmatprep.subr.bf16.mxu1 %v3020_v30  ;;  %2357 = vmatprep.subr.bf16.mxu0 %v3023_v31  ;;  %v1451_v30 = vld [vmem:[%s4007_s14] sm:$0xf]  ;;  %v1459_v31 = vsub.s32 1, %v3762_v15 }
 0x5a4   :  { %2346 = vmatprep.mubr.bf16.mxu1 %v1905_v22  ;;  %2387 = vmatprep.mubr.bf16.mxu0 %v1905_v22 }
 0x5a6   :  { %2317 = vmatpush1.bf16.msra.mxu1 %v3018_v32  ;;  %2358 = vmatpush1.bf16.msra.mxu0 %v3021_v33  ;;  %v1456_v32 = vrot.slane %v1451_v30, %v3772_v25  ;;  %v1460_v33 = vrot.slane %v1451_v30, %v1459_v31 }
 0x5a7   :  { %2318 = vmatprep.subr.bf16.mxu1 %v3026_v34  ;;  %2359 = vmatprep.subr.bf16.mxu0 %v3029_v17 }
 0x5aa   :  { %2319 = vmatpush1.bf16.msra.mxu1 %v3024_v35  ;;  %2360 = vmatpush1.bf16.msra.mxu0 %v3027_v36  ;;  %v1467_v35 = vsub.s32 3, %v3762_v15 }
 0x5ab   :  { %2320 = vmatprep.subr.bf16.mxu1 %v3032_v37  ;;  %2361 = vmatprep.subr.bf16.mxu0 %v3035_v38 }
 0x5ae   :  { %2321 = vmatpush1.bf16.msra.mxu1 %v3030_v39  ;;  %2362 = vmatpush1.bf16.msra.mxu0 %v3033_v40 }
 0x5af   :  { %2322 = vmatprep.subr.bf16.mxu1 %v3038_v41  ;;  %2363 = vmatprep.subr.bf16.mxu0 %v3041_v42 }
 0x5b2   :  { %2323 = vmatpush1.bf16.msra.mxu1 %v3036_v43  ;;  %2364 = vmatpush1.bf16.msra.mxu0 %v3039_v44 }
 0x5b3   :  { %2324 = vmatprep.subr.bf16.mxu1 %v3044_v45  ;;  %2365 = vmatprep.subr.bf16.mxu0 %v3047_v46  ;;  %v1468_v46 = vrot.slane %v1451_v30, %v1467_v35 }
 0x5b6   :  { %2325 = vmatpush1.bf16.msra.mxu1 %v3042_v47  ;;  %2366 = vmatpush1.bf16.msra.mxu0 %v3045_v48  ;;  %v1463_v47 = vsub.s32 2, %v3762_v15 }
 0x5b7   :  { %2326 = vmatprep.subr.bf16.mxu1 %v3050_v49  ;;  %2367 = vmatprep.subr.bf16.mxu0 %v3053_v50 }
 0x5b8   :  { %v1464_v49 = vrot.slane %v1451_v30, %v1463_v47 }
 0x5ba   :  { %2327 = vmatpush1.bf16.msra.mxu1 %v3048_v51  ;;  %2368 = vmatpush1.bf16.msra.mxu0 %v3051_v52 }
 0x5bb   :  { %2328 = vmatprep.subr.bf16.mxu1 %v3056_v53  ;;  %2369 = vmatprep.subr.bf16.mxu0 %v3059_v54 }
 0x5be   :  { %2329 = vmatpush1.bf16.msra.mxu1 %v3054_v55  ;;  %2370 = vmatpush1.bf16.msra.mxu0 %v3057_v56 }
 0x5bf   :  { %2330 = vmatprep.subr.bf16.mxu1 %v3062_v57  ;;  %2371 = vmatprep.subr.bf16.mxu0 %v3065_v58  ;;  %v1384_v58 = vld [vmem:[#allocation8] sm:$0xff] }
 0x5c2   :  { %2331 = vmatpush1.bf16.msra.mxu1 %v3060_v59  ;;  %2372 = vmatpush1.bf16.msra.mxu0 %v3063_v61 }
 0x5c3   :  { %2332 = vmatprep.subr.bf16.mxu1 %v3068_v62  ;;  %2373 = vmatprep.subr.bf16.mxu0 %v3071_v63 }
 0x5c6   :  { %2333 = vmatpush1.bf16.msra.mxu1 %v3066_v1  ;;  %2374 = vmatpush1.bf16.msra.mxu0 %v3069_v2 }
 0x5c7   :  { %2334 = vmatprep.subr.bf16.mxu1 %v3074_v3  ;;  %2375 = vmatprep.subr.bf16.mxu0 %v3077_v4 }
 0x5ca   :  { %2335 = vmatpush1.bf16.msra.mxu1 %v3072_v5  ;;  %2376 = vmatpush1.bf16.msra.mxu0 %v3075_v6 }
 0x5cb   :  { %2336 = vmatprep.subr.bf16.mxu1 %v3080_v7  ;;  %2377 = vmatprep.subr.bf16.mxu0 %v3083_v8 }
 0x5ce   :  { %2337 = vmatpush1.bf16.msra.mxu1 %v3078_v9  ;;  %2378 = vmatpush1.bf16.msra.mxu0 %v3081_v10 }
 0x5cf   :  { %2338 = vmatprep.subr.bf16.mxu1 %v3086_v11  ;;  %2379 = vmatprep.subr.bf16.mxu0 %v3089_v14 }
 0x5d2   :  { %2339 = vmatpush1.bf16.msra.mxu1 %v3084_v60  ;;  %2380 = vmatpush1.bf16.msra.mxu0 %v3087_v12 }
 0x5d3   :  { %2340 = vmatprep.subr.bf16.mxu1 %v3092_v16  ;;  %2381 = vmatprep.subr.bf16.mxu0 %v3095_v0 }
 0x5d6   :  { %2341 = vmatpush1.bf16.msra.mxu1 %v3090_v18  ;;  %2382 = vmatpush1.bf16.msra.mxu0 %v3093_v19 }
 0x5d7   :  { %2342 = vmatprep.subr.bf16.mxu1 %v3098_v20  ;;  %2383 = vmatprep.subr.bf16.mxu0 %v3101_v21 }
 0x5da   :  { %2343 = vmatpush1.bf16.msra.mxu1 %v3096_v23  ;;  %2384 = vmatpush1.bf16.msra.mxu0 %v3099_v24 }
 0x5db   :  { %2344 = vmatprep.subr.bf16.mxu1 %v3104_v26  ;;  %2385 = vmatprep.subr.bf16.mxu0 %v3107_v27 }
 0x5de   :  { %2345 = vmatpush1.bf16.msra.mxu1 %v3102_v28  ;;  %2386 = vmatpush1.bf16.msra.mxu0 %v3105_v29 }
 0x674   :  { %v1827_v34 = vpop.f32.mrb[28].mxu1  ;;  %v1868_v17 = vpop.f32.mrb[16].mxu0 }
 0x675   :  { %v1828_v36 = vadd.f32 %v1827_v34, %v1456_v32  ;;  %v1829_v37 = vpop.f32.mrb[29].mxu1  ;;  %v1870_v38 = vpop.f32.mrb[17].mxu0  ;;  %v1869_v51 = vadd.f32 %v1868_v17, %v1464_v49 }
 0x676   :  { %v1830_v39 = vadd.f32 %v1829_v37, %v1460_v33  ;;  %v1831_v40 = vpop.f32.mrb[30].mxu1  ;;  %v1872_v41 = vpop.f32.mrb[18].mxu0  ;;  %v1871_v48 = vadd.f32 %v1870_v38, %v1468_v46 }
 0x677   :  { %v2601_v42 = vmul.f32 -1.442695, %v1828_v36  ;;  %v1832_v43 = vpop.f32.mrb[31].mxu1  ;;  %v1873_v44 = vpop.f32.mrb[19].mxu0 }
 0x678   :  { %v2602_v45 = vmul.f32 -1.442695, %v1830_v39  ;;  %v2603_v50 = vmul.f32 -1.442695, %v1871_v48 }
 0x679   :  { %3144 = vpow2.f32 %v2601_v42 }
 0x67a   :  { %3146 = vpow2.f32 %v2602_v45 }
 0x67b   :  { %3148 = vpow2.f32 %v2603_v50 }
 0x67c   :  { %3150 = vtanh.f32 %v1869_v51 }
 0x683   :  { %v3145_v52 = vpop.eup %3144 }
 0x684   :  { %v3147_v53 = vpop.eup %3146  ;;  %v1878_v54 = vadd.f32 1.0, %v3145_v52 }
 0x685   :  { %v1884_v55 = vadd.f32 1.0, %v3147_v53  ;;  %v3149_v56 = vpop.eup %3148 }
 0x686   :  { %3152 = vrcp.f32 %v1878_v54  ;;  %v3151_v57 = vpop.eup %3150  ;;  %v1891_v63 = vadd.f32 1.0, %v3149_v56 }
 0x687   :  { %3154 = vrcp.f32 %v1884_v55 }
 0x688   :  { %3156 = vrcp.f32 %v1891_v63 }
 0x690   :  { %v3153_v59 = vpop.eup %3152 }
 0x691   :  { %v3155_v61 = vpop.eup %3154  ;;  %v1895_v62 = vmul.f32 %v3153_v59, %v3151_v57 }
 0x692   :  { %v1894_v1 = vmul.f32 %v3155_v61, %v1384_v58  ;;  %v3157_v3 = vpop.eup %3156 }
 0x694   :  { %v1896_v2 = vadd.f32 %v1895_v62, %v1894_v1 }
 0x696   :  { %3158 = vtanh.f32 %v1896_v2  ;;  %1900 = vst [vmem:[#allocation21] sm:$0xff] %v1896_v2 }
 0x6a0   :  { %v3159_v4 = vpop.eup %3158 }
 0x6a1   :  { %v1898_v5 = vmul.f32 %v3159_v4, %v3157_v3 }
 0x6a3   :  { %v1904_v6 = vpack.c.bf16 %v1898_v5, %v1898_v5  ;;  %1899 = vst [vmem:[#allocation19] sm:$0xff] %v1898_v5 }
 0x6a5   :  { %2347 = vmatmul.mubr.bf16.vlgmr.msra.gmra.mrb[32].mxu1 %v1904_v6  ;;  %2388 = vmatmul.mubr.bf16.vlgmr.msra.gmra.mrb[20].mxu0 %v1904_v6 }
 0x6a6   :  { %3385 = shalt.err (!%p3382_p6)
}
 0x6a7   :  { %s3386_s11 = scalar_lea.hbm %s4011_s18, 128 }
 0x6a8   :  { %p3387_p7 = scmp.ne.s32.totalorder %s4011_s18, %s3386_s11  ;;  %p3390_p8 = scmp.lt.u32.totalorder %s3386_s11, %s4011_s18 }
 0x6aa   :  { %p3392_p9 = pnand %p3390_p8, %p3387_p7 }
 0x6ac   :  { %3395 = shalt.err (!%p3392_p9)
}
 0x6ad   :  { %2469 = dma.vmem_to_hbm [thread:$0]  %s2467_s29, 128, %s4011_s18, [#allocation23]   ;;  %v2604_v7 = vld [vmem:[%s4007_s14 + $0x4] sm:$0xf]  ;;  %v1903_v33 = vld [vmem:[#allocation8 + $0x8] sm:$0xff] }
 0x6ae   :  { %v1977_v8 = vrot.slane %v2604_v7, %v3772_v25  ;;  %v1981_v9 = vrot.slane %v2604_v7, %v1459_v31  ;;  %v1989_v22 = vrot.slane %v2604_v7, %v1467_v35  ;;  %v1985_v23 = vrot.slane %v2604_v7, %v1463_v47  ;;  %s3497_s14 = smov [#allocation19]   ;;  %s3498_s25 = smov [#allocation21]  }
 0x6af   :  { %s2441_s18 = sshll.u32 %s3497_s14, 4  ;;  %s2453_s7 = sshll.u32 %s3498_s25, 4  ;;  %s2442_s18 = int_to_ptr.vmem [resolvable:$true] %s2441_s18  ;;  %s3937_s7 = int_to_ptr.vmem [resolvable:$true] %s2453_s7 }
 0x6b0   :  { %s3499_s26 = smov [#allocation18]   ;;  %s3396_s23 = scalar_lea.vmem %s2442_s18, 256 }
 0x6b1   :  { %s2432_s8 = sshll.u32 %s3499_s26, 4  ;;  %p3397_p10 = scmp.ne.s32.totalorder %s2442_s18, %s3396_s23  ;;  %s3939_s8 = int_to_ptr.vmem [resolvable:$true] %s2432_s8 }
 0x6b2   :  { %p3401_p11 = scmp.lt.s32.totalorder %s2442_s18, %s2442_s18  ;;  %p3402_p12 = scmp.lt.s32.totalorder %s3396_s23, %s3396_s23 }
 0x6b4   :  { %p3403_p13 = por %p3402_p12, %p3401_p11 }
 0x6b6   :  { %p3404_p0 = pnand %p3403_p13, %p3397_p10 }
 0x778   :  { %v2348_v10 = vpop.f32.mrb[32].mxu1  ;;  %v2389_v60 = vpop.f32.mrb[20].mxu0 }
 0x779   :  { %v2349_v11 = vadd.f32 %v2348_v10, %v1977_v8  ;;  %v2350_v12 = vpop.f32.mrb[33].mxu1  ;;  %v2391_v14 = vpop.f32.mrb[21].mxu0  ;;  %v2390_v26 = vadd.f32 %v2389_v60, %v1985_v23 }
 0x77a   :  { %v2351_v16 = vadd.f32 %v2350_v12, %v1981_v9  ;;  %v2352_v0 = vpop.f32.mrb[34].mxu1  ;;  %v2393_v18 = vpop.f32.mrb[22].mxu0  ;;  %v2392_v25 = vadd.f32 %v2391_v14, %v1989_v22 }
 0x77b   :  { %v2669_v19 = vmul.f32 -1.442695, %v2349_v11  ;;  %v2353_v20 = vpop.f32.mrb[35].mxu1  ;;  %v2394_v21 = vpop.f32.mrb[23].mxu0 }
 0x77c   :  { %v2670_v13 = vmul.f32 -1.442695, %v2351_v16  ;;  %v2671_v24 = vmul.f32 -1.442695, %v2392_v25 }
 0x77d   :  { %3160 = vpow2.f32 %v2669_v19 }
 0x77e   :  { %3162 = vpow2.f32 %v2670_v13 }
 0x77f   :  { %3164 = vpow2.f32 %v2671_v24 }
 0x780   :  { %3166 = vtanh.f32 %v2390_v26 }
 0x787   :  { %v3161_v27 = vpop.eup %3160 }
 0x788   :  { %v3163_v28 = vpop.eup %3162  ;;  %v2399_v29 = vadd.f32 1.0, %v3161_v27 }
 0x789   :  { %v2405_v30 = vadd.f32 1.0, %v3163_v28  ;;  %v3165_v31 = vpop.eup %3164 }
 0x78a   :  { %3168 = vrcp.f32 %v2399_v29  ;;  %v3167_v32 = vpop.eup %3166  ;;  %v2412_v36 = vadd.f32 1.0, %v3165_v31 }
 0x78b   :  { %3170 = vrcp.f32 %v2405_v30 }
 0x78c   :  { %3172 = vrcp.f32 %v2412_v36 }
 0x794   :  { %v3169_v34 = vpop.eup %3168 }
 0x795   :  { %v3171_v17 = vpop.eup %3170  ;;  %v2416_v35 = vmul.f32 %v3169_v34, %v3167_v32 }
 0x796   :  { %v2415_v37 = vmul.f32 %v3171_v17, %v1903_v33  ;;  %v3173_v38 = vpop.eup %3172 }
 0x798   :  { %v2417_v15 = vadd.f32 %v2416_v35, %v2415_v37 }
 0x79a   :  { %2423 = vst [vmem:[#allocation21 + $0x8] sm:$0xff] %v2417_v15  ;;  %3174 = vtanh.f32 %v2417_v15 }
 0x7a4   :  { %v3175_v39 = vpop.eup %3174 }
 0x7a5   :  { %v2419_v40 = vmul.f32 %v3175_v39, %v3173_v38 }
 0x7a7   :  { %2421 = vst [vmem:[#allocation19 + $0x8] sm:$0xff] %v2419_v40  ;;  %v2424_v41 = vpack.c.bf16 %v2419_v40, %v2419_v40 }
 0x7a8   :  { %3407 = shalt.err (!%p3404_p0)
}
 0x7a9   :  { %s3408_s5 = scalar_lea.hbm %s4009_s16, 256 }
 0x7aa   :  { %p3409_p1 = scmp.ne.s32.totalorder %s4009_s16, %s3408_s5  ;;  %p3412_p2 = scmp.lt.u32.totalorder %s3408_s5, %s4009_s16 }
 0x7ac   :  { %p3414_p3 = pnand %p3412_p2, %p3409_p1 }
 0x7ae   :  { %3417 = shalt.err (!%p3414_p3)
}
 0x7af   :  { %2447 = dma.vmem_to_hbm [thread:$0]  %s2442_s18, 256, %s4009_s16, [#allocation20], %s4028_s27, %s4028_s27, %s4027_s2   ;;  %2425 = vst [vmem:[#allocation18] sm:$0xf] %v2424_v41 }
 0x7b0   :  { %s3418_s15 = scalar_lea.vmem %s3937_s7, 256  ;;  %p3423_p5 = scmp.lt.s32.totalorder %s3937_s7, %s3937_s7 }
 0x7b1   :  { %p3419_p4 = scmp.ne.s32.totalorder %s3937_s7, %s3418_s15  ;;  %p3424_p6 = scmp.lt.s32.totalorder %s3418_s15, %s3418_s15 }
 0x7b3   :  { %p3425_p7 = por %p3424_p6, %p3423_p5 }
 0x7b5   :  { %p3426_p8 = pnand %p3425_p7, %p3419_p4 }
 0x7b7   :  { %3429 = shalt.err (!%p3426_p8)
}
 0x7b8   :  { %s3430_s21 = scalar_lea.hbm %s4010_s17, 256 }
 0x7b9   :  { %p3431_p9 = scmp.ne.s32.totalorder %s4010_s17, %s3430_s21  ;;  %p3434_p10 = scmp.lt.u32.totalorder %s3430_s21, %s4010_s17 }
 0x7bb   :  { %p3436_p11 = pnand %p3434_p10, %p3431_p9 }
 0x7bd   :  { %3439 = shalt.err (!%p3436_p11)
}
 0x7be   :  { %2459 = dma.vmem_to_hbm [thread:$0]  %s3937_s7, 256, %s4010_s17, [#allocation20], %s4028_s27, %s4028_s27, %s4027_s2  }
 0x7bf   :  { %s3440_s6 = scalar_lea.vmem %s3939_s8, 64  ;;  %p3445_p13 = scmp.lt.s32.totalorder %s3939_s8, %s3939_s8 }
 0x7c0   :  { %p3441_p12 = scmp.ne.s32.totalorder %s3939_s8, %s3440_s6  ;;  %p3446_p0 = scmp.lt.s32.totalorder %s3440_s6, %s3440_s6 }
 0x7c2   :  { %p3447_p1 = por %p3446_p0, %p3445_p13 }
 0x7c4   :  { %p3448_p2 = pnand %p3447_p1, %p3441_p12 }
 0x7c6   :  { %3451 = shalt.err (!%p3448_p2)
}
 0x7c7   :  { %s4029_s18 = sld [smem:[#allocation35_spill]] }
 0x7cd   :  { %s3452_s25 = scalar_lea.hbm %s4029_s18, 64 }
 0x7ce   :  { %p3453_p3 = scmp.ne.s32.totalorder %s4029_s18, %s3452_s25  ;;  %p3456_p4 = scmp.lt.u32.totalorder %s3452_s25, %s4029_s18 }
 0x7d0   :  { %p3458_p5 = pnand %p3456_p4, %p3453_p3 }
 0x7d2   :  { %3461 = shalt.err (!%p3458_p5)
}
 0x7d3   :  { %2435 = dma.vmem_to_hbm [thread:$0]  %s3939_s8, 64, %s4029_s18, [#allocation5]  }
 0x7d4   :  { %3472 = dma.done.wait [#allocation5], 64  }
 0x7d5   :  { %3473 = vsyncadd [#allocation5], 4294967232 }
 0x7d6   :  { %3474 = dma.done.wait [#allocation20], 512  }
 0x7d7   :  { %3475 = vsyncadd [#allocation20], 4294966784 }
 0x7d8   :  { %3476 = dma.done.wait [#allocation23], 128  }
 0x7d9   :  { %3477 = vsyncadd [#allocation23], 4294967168 }
 0x7da   :  { %2482 = vsyncpa [#allocation4], 1 }
 0x7db   :  { %2483 = vsyncpa [#allocation7], 1 }
 0x7dc   :  { %2484 = vsyncpa [#allocation10], 1 }
 0x7dd   :  { %2485 = vsyncpa [#allocation13], 1 }
 0x7de   :  { %2486 = vsyncpa [#allocation16], 1 }
 0x7df   :  { %2487 = vsyncpa [#allocation5], 1 }
 0x7e0   :  { %2488 = vsyncpa [#allocation20], 1 }
 0x7e1   :  { %2489 = vsyncpa [#allocation23], 1 }

</bundles_post_ra>
